<compile_context>
chip_gen: v6e
topology: v6e:2x2x1
jax: 0.10.0
libtpu: 0.0.40
codegen_flags: <defaults>
</compile_context>

<pallas_src>
import functools

import jax
import jax.numpy as jnp
import numpy as np
from jax.experimental import pallas as pl
from jax.experimental.pallas import tpu as pltpu


_VMEM_SPEC = pl.BlockSpec(memory_space=pltpu.MemorySpace.VMEM)


# ----------------------------- Fused Pallas kernel -------------------------- #

def make_sentiment_kernel(n_layers, T, B, H, O, n_out):
    """Build the fused multi-layer-LSTM -> fc -> sigmoid kernel.

    Ref layout (flat, in order):
      inputs : x_flat (T*B, E) time-major, h0 (L,B,H), c0 (L,B,H),
               per layer [wih_t (in,4H), whh_t (H,4H), bias (1,4H)],
               fc_w_t (H,O), fc_b (1,O)
      outputs: sig (B, n_out), h_n (L,B,H), c_n (L,B,H)
      scratch: xw (T*B,4H) f32, seq (T*B,H) f32, col (B, n_tail*O) f32
    """
    n_tail = min(T, -(-n_out // O))      # ceil(n_out / O) timesteps needed for fc
    nt = n_tail * O

    def kernel(*refs):
        x_ref, h0_ref, c0_ref = refs[0], refs[1], refs[2]
        p = 3
        layer_refs = []
        for _ in range(n_layers):
            layer_refs.append(refs[p:p + 3])
            p += 3
        fcw_ref, fcb_ref = refs[p], refs[p + 1]
        p += 2
        sig_ref, hN_ref, cN_ref = refs[p], refs[p + 1], refs[p + 2]
        p += 3
        xw_scr, seq_scr, col_scr = refs[p], refs[p + 1], refs[p + 2]

        for layer in range(n_layers):
            wih_ref, whh_ref, b_ref = layer_refs[layer]
            src = x_ref[...] if layer == 0 else seq_scr[...]       # (T*B, in_dim)

            # Hoisted input projection (+bias) for the whole sequence: one big
            # MXU matmul instead of T tiny ones inside the recurrence.
            xw_scr[...] = (
                jnp.dot(src, wih_ref[...], preferred_element_type=jnp.float32)
                + b_ref[...])                                       # (T*B, 4H)

            whh = whh_ref[...]
            h = h0_ref[layer].astype(jnp.float32)
            c = c0_ref[layer].astype(jnp.float32)

            # Fully unrolled recurrence: only h @ W_hh sits on the serial path.
            for t in range(T):
                gates = xw_scr[t * B:(t + 1) * B, :] + jnp.dot(
                    h, whh, preferred_element_type=jnp.float32)     # (B, 4H)
                sg = jax.nn.sigmoid(gates)          # one full-width EUP sigmoid
                i_g = sg[:, 0 * H:1 * H]            # PyTorch gate order: i,f,g,o
                f_g = sg[:, 1 * H:2 * H]
                o_g = sg[:, 3 * H:4 * H]
                g_g = jnp.tanh(gates[:, 2 * H:3 * H])
                c = f_g * c + i_g * g_g
                h = o_g * jnp.tanh(c)
                seq_scr[t * B:(t + 1) * B, :] = h

            hN_ref[layer] = h.astype(hN_ref.dtype)
            cN_ref[layer] = c.astype(cN_ref.dtype)

        # fc + sigmoid only for the timesteps feeding sig_out[:, -n_out:].
        fcw = fcw_ref[...]
        fcb = fcb_ref[...]
        dest = sig_ref if nt == n_out else col_scr
        for j in range(n_tail):
            t = T - n_tail + j
            y = jnp.dot(seq_scr[t * B:(t + 1) * B, :], fcw,
                        preferred_element_type=jnp.float32) + fcb   # (B, O)
            dest[:, j * O:(j + 1) * O] = jax.nn.sigmoid(y)
        if nt != n_out:
            sig_ref[...] = col_scr[:, nt - n_out:nt]

    return kernel


# ------------------------------- Wrapper ------------------------------------ #

@functools.partial(jax.jit, static_argnames=("n_layers", "hidden_dim"))
def sentiment_forward(x, h0, c0, params, *, n_layers, hidden_dim):
    """x: (B, T, E) f32; h0/c0: (n_layers, B, H). Returns (sig_out[:, -5:], (h_n, c_n))."""
    n_out = 5
    B, T, E = x.shape
    H = hidden_dim
    O = params["fc_w_t"].shape[1]
    assert T * O >= n_out, "forward slices the last 5 columns; need T*O >= 5"

    # One small XLA transpose+flatten to time-major; the kernel never round-trips
    # activations through HBM after this point.
    x_flat = jnp.transpose(x, (1, 0, 2)).reshape(T * B, E)

    # TODO(synk): inter-layer LSTM dropout and nn.Dropout(0.3) are stochastic
    # training-only ops; forward here uses eval-mode (identity) semantics.

    n_tail = min(T, -(-n_out // O))
    inputs = [x_flat, h0, c0]
    for layer in range(n_layers):
        inputs.extend(params["lstm"][layer])
    inputs.extend([params["fc_w_t"], params["fc_b"]])

    kernel = make_sentiment_kernel(n_layers, T, B, H, O, n_out)
    sig_out, h_n, c_n = pl.pallas_call(
        kernel,
        out_shape=(jax.ShapeDtypeStruct((B, n_out), jnp.float32),
                   jax.ShapeDtypeStruct((n_layers, B, H), jnp.float32),
                   jax.ShapeDtypeStruct((n_layers, B, H), jnp.float32)),
        in_specs=[_VMEM_SPEC] * len(inputs),
        out_specs=(_VMEM_SPEC, _VMEM_SPEC, _VMEM_SPEC),
        scratch_shapes=[pltpu.VMEM((T * B, 4 * H), jnp.float32),
                        pltpu.VMEM((T * B, H), jnp.float32),
                        pltpu.VMEM((B, n_tail * O), jnp.float32)],
    )(*inputs)
    return sig_out, (h_n, c_n)


# --------------------------- Pure-JAX reference ------------------------------ #

def _reference_forward(x, h0, c0, params, n_layers, hidden_dim):
    B, T, _ = x.shape
    H = hidden_dim
    layer_in = x
    h_ns, c_ns = [], []
    for layer in range(n_layers):
        wih_t, whh_t, b_2d = params["lstm"][layer]
        h = h0[layer]
        c = c0[layer]
        outs = []
        for t in range(T):
            gates = layer_in[:, t, :] @ wih_t + h @ whh_t + b_2d
            i_g = jax.nn.sigmoid(gates[:, 0 * H:1 * H])
            f_g = jax.nn.sigmoid(gates[:, 1 * H:2 * H])
            g_g = jnp.tanh(gates[:, 2 * H:3 * H])
            o_g = jax.nn.sigmoid(gates[:, 3 * H:4 * H])
            c = f_g * c + i_g * g_g
            h = o_g * jnp.tanh(c)
            outs.append(h)
        layer_in = jnp.stack(outs, axis=1)
        h_ns.append(h)
        c_ns.append(c)
    flat = layer_in.reshape(-1, H)
    sig = jax.nn.sigmoid(flat @ params["fc_w_t"] + params["fc_b"])
    sig = sig.reshape(B, -1)[:, -5:]
    return sig, (jnp.stack(h_ns), jnp.stack(c_ns))


# --------------------------------- Main -------------------------------------- #

if __name__ == "__main__":
    # Small shapes consistent with the module's forward (B=8 keeps the batch rows
    # sublane-aligned so all per-step slices are full, unmasked 8-row tiles).
    B, T = 8, 8                 # batch, sequence length
    E, H = 16, 32               # embedding_dim, hidden_dim
    L, O = 2, 1                 # n_layers, output_size

    key = jax.random.PRNGKey(0)
    keys = jax.random.split(key, 2 + 6 * L)

    bound = 1.0 / np.sqrt(H)    # PyTorch-style uniform init range

    x = jax.random.normal(keys[0], (B, T, E), dtype=jnp.float32)
    h0 = jnp.zeros((L, B, H), dtype=jnp.float32)   # init_hidden(batch_size)
    c0 = jnp.zeros((L, B, H), dtype=jnp.float32)

    lstm_params = []
    kidx = 1
    for layer in range(L):
        in_dim = E if layer == 0 else H
        w_ih = jax.random.uniform(keys[kidx + 0], (4 * H, in_dim),
                                  minval=-bound, maxval=bound, dtype=jnp.float32)
        w_hh = jax.random.uniform(keys[kidx + 1], (4 * H, H),
                                  minval=-bound, maxval=bound, dtype=jnp.float32)
        b_ih = jax.random.uniform(keys[kidx + 2], (4 * H,),
                                  minval=-bound, maxval=bound, dtype=jnp.float32)
        b_hh = jax.random.uniform(keys[kidx + 3], (4 * H,),
                                  minval=-bound, maxval=bound, dtype=jnp.float32)
        kidx += 4
        lstm_params.append((w_ih.T, w_hh.T, (b_ih + b_hh).reshape(1, 4 * H)))

    fc_w = jax.random.uniform(keys[kidx + 0], (O, H),
                              minval=-bound, maxval=bound, dtype=jnp.float32)
    fc_b = jax.random.uniform(keys[kidx + 1], (O,),
                              minval=-bound, maxval=bound, dtype=jnp.float32)

    params = {"lstm": tuple(lstm_params),
              "fc_w_t": fc_w.T,
              "fc_b": fc_b.reshape(1, O)}

    sig_out, (h_n, c_n) = sentiment_forward(x, h0, c0, params,
                                            n_layers=L, hidden_dim=H)
    jax.block_until_ready((sig_out, h_n, c_n))

    # Sanity check against a pure-JAX reference of the same math.
    ref_sig, (ref_h, ref_c) = _reference_forward(x, h0, c0, params, L, H)
    np.testing.assert_allclose(np.asarray(sig_out), np.asarray(ref_sig), rtol=1e-5, atol=1e-5)
    np.testing.assert_allclose(np.asarray(h_n), np.asarray(ref_h), rtol=1e-5, atol=1e-5)
    np.testing.assert_allclose(np.asarray(c_n), np.asarray(ref_c), rtol=1e-5, atol=1e-5)

    assert sig_out.shape == (B, 5)
    assert h_n.shape == (L, B, H) and c_n.shape == (L, B, H)

    print("KERNEL_OK")
</pallas_src>

<mosaic_0001>
module attributes {stable_mosaic.version = 11 : i64} {
  func.func @kernel(%arg0: memref<64x16xf32, #tpu.memory_space<vmem>>, %arg1: memref<2x8x32xf32, #tpu.memory_space<vmem>>, %arg2: memref<2x8x32xf32, #tpu.memory_space<vmem>>, %arg3: memref<16x128xf32, #tpu.memory_space<vmem>>, %arg4: memref<32x128xf32, #tpu.memory_space<vmem>>, %arg5: memref<1x128xf32, #tpu.memory_space<vmem>>, %arg6: memref<32x128xf32, #tpu.memory_space<vmem>>, %arg7: memref<32x128xf32, #tpu.memory_space<vmem>>, %arg8: memref<1x128xf32, #tpu.memory_space<vmem>>, %arg9: memref<32x1xf32, #tpu.memory_space<vmem>>, %arg10: memref<1x1xf32, #tpu.memory_space<vmem>>, %arg11: memref<8x5xf32, #tpu.memory_space<vmem>>, %arg12: memref<2x8x32xf32, #tpu.memory_space<vmem>>, %arg13: memref<2x8x32xf32, #tpu.memory_space<vmem>>, %arg14: memref<64x128xf32, #tpu.memory_space<vmem>>, %arg15: memref<64x32xf32, #tpu.memory_space<vmem>>, %arg16: memref<8x5xf32, #tpu.memory_space<vmem>>) attributes {dimension_semantics = [], scalar_prefetch = 0 : i64, scratch_operands = 3 : i64, tpu.core_type = #tpu.core_type<tc>} {
    %c0 = arith.constant 0 : index
    %c0_0 = arith.constant 0 : index
    %0 = vector.load %arg0[%c0, %c0_0] : memref<64x16xf32, #tpu.memory_space<vmem>>, vector<64x16xf32>
    %c0_1 = arith.constant 0 : index
    %c0_2 = arith.constant 0 : index
    %1 = vector.load %arg3[%c0_1, %c0_2] : memref<16x128xf32, #tpu.memory_space<vmem>>, vector<16x128xf32>
    %cst = arith.constant dense<0.000000e+00> : vector<64x128xf32>
    %2 = tpu.matmul %0, %1, %cst {dimension_numbers = #tpu.dot_dimension_numbers<[1], [0], [0], [1], [0, 0, 1, 1], [], []>} : vector<64x16xf32>, vector<16x128xf32>, vector<64x128xf32> -> vector<64x128xf32>
    %c0_3 = arith.constant 0 : index
    %c0_4 = arith.constant 0 : index
    %3 = vector.load %arg5[%c0_3, %c0_4] : memref<1x128xf32, #tpu.memory_space<vmem>>, vector<1x128xf32>
    %4 = vector.broadcast %3 : vector<1x128xf32> to vector<64x128xf32>
    %5 = arith.addf %2, %4 : vector<64x128xf32>
    %c0_5 = arith.constant 0 : index
    %c0_6 = arith.constant 0 : index
    %6 = vector.load %arg14[%c0_5, %c0_6] : memref<64x128xf32, #tpu.memory_space<vmem>>, vector<64x128xf32>
    tpu.vector_store %arg14[%c0_5, %c0_6], %5 {strides = array<i32>} : memref<64x128xf32, #tpu.memory_space<vmem>>, vector<64x128xf32>,
    %c0_7 = arith.constant 0 : index
    %c0_8 = arith.constant 0 : index
    %7 = vector.load %arg4[%c0_7, %c0_8] : memref<32x128xf32, #tpu.memory_space<vmem>>, vector<32x128xf32>
    %c0_9 = arith.constant 0 : index
    %c0_10 = arith.constant 0 : index
    %c0_11 = arith.constant 0 : index
    %8 = vector.load %arg1[%c0_9, %c0_10, %c0_11] : memref<2x8x32xf32, #tpu.memory_space<vmem>>, vector<1x8x32xf32>
    %9 = vector.shape_cast %8 : vector<1x8x32xf32> to vector<8x32xf32>
    %c0_12 = arith.constant 0 : index
    %c0_13 = arith.constant 0 : index
    %c0_14 = arith.constant 0 : index
    %10 = vector.load %arg2[%c0_12, %c0_13, %c0_14] : memref<2x8x32xf32, #tpu.memory_space<vmem>>, vector<1x8x32xf32>
    %11 = vector.shape_cast %10 : vector<1x8x32xf32> to vector<8x32xf32>
    %c0_15 = arith.constant 0 : index
    %c0_16 = arith.constant 0 : index
    %12 = vector.load %arg14[%c0_15, %c0_16] : memref<64x128xf32, #tpu.memory_space<vmem>>, vector<8x128xf32>
    %cst_17 = arith.constant dense<0.000000e+00> : vector<8x128xf32>
    %13 = tpu.matmul %9, %7, %cst_17 {dimension_numbers = #tpu.dot_dimension_numbers<[1], [0], [0], [1], [0, 0, 1, 1], [], []>} : vector<8x32xf32>, vector<32x128xf32>, vector<8x128xf32> -> vector<8x128xf32>
    %14 = arith.addf %12, %13 : vector<8x128xf32>
    %15 = arith.negf %14 : vector<8x128xf32>
    %16 = math.exp %15 : vector<8x128xf32>
    %cst_18 = arith.constant 1.000000e+00 : f32
    %17 = vector.broadcast %cst_18 : f32 to vector<8x128xf32>
    %18 = arith.addf %17, %16 : vector<8x128xf32>
    %19 = arith.divf %17, %18 : vector<8x128xf32>
    %20 = vector.extract_strided_slice %19 {offsets = [0, 0], sizes = [8, 32], strides = [1, 1]} : vector<8x128xf32> to vector<8x32xf32>
    %21 = vector.extract_strided_slice %19 {offsets = [0, 32], sizes = [8, 32], strides = [1, 1]} : vector<8x128xf32> to vector<8x32xf32>
    %22 = vector.extract_strided_slice %19 {offsets = [0, 96], sizes = [8, 32], strides = [1, 1]} : vector<8x128xf32> to vector<8x32xf32>
    %23 = vector.extract_strided_slice %14 {offsets = [0, 64], sizes = [8, 32], strides = [1, 1]} : vector<8x128xf32> to vector<8x32xf32>
    %24 = math.tanh %23 : vector<8x32xf32>
    %25 = arith.mulf %21, %11 : vector<8x32xf32>
    %26 = arith.mulf %20, %24 : vector<8x32xf32>
    %27 = arith.addf %25, %26 : vector<8x32xf32>
    %28 = math.tanh %27 : vector<8x32xf32>
    %29 = arith.mulf %22, %28 : vector<8x32xf32>
    %c0_19 = arith.constant 0 : index
    %c0_20 = arith.constant 0 : index
    %30 = vector.load %arg15[%c0_19, %c0_20] : memref<64x32xf32, #tpu.memory_space<vmem>>, vector<8x32xf32>
    tpu.vector_store %arg15[%c0_19, %c0_20], %29 {strides = array<i32>} : memref<64x32xf32, #tpu.memory_space<vmem>>, vector<8x32xf32>,
    %c8 = arith.constant 8 : index
    %c0_21 = arith.constant 0 : index
    %31 = vector.load %arg14[%c8, %c0_21] : memref<64x128xf32, #tpu.memory_space<vmem>>, vector<8x128xf32>
    %cst_22 = arith.constant dense<0.000000e+00> : vector<8x128xf32>
    %32 = tpu.matmul %29, %7, %cst_22 {dimension_numbers = #tpu.dot_dimension_numbers<[1], [0], [0], [1], [0, 0, 1, 1], [], []>} : vector<8x32xf32>, vector<32x128xf32>, vector<8x128xf32> -> vector<8x128xf32>
    %33 = arith.addf %31, %32 : vector<8x128xf32>
    %34 = arith.negf %33 : vector<8x128xf32>
    %35 = math.exp %34 : vector<8x128xf32>
    %cst_23 = arith.constant 1.000000e+00 : f32
    %36 = vector.broadcast %cst_23 : f32 to vector<8x128xf32>
    %37 = arith.addf %36, %35 : vector<8x128xf32>
    %38 = arith.divf %36, %37 : vector<8x128xf32>
    %39 = vector.extract_strided_slice %38 {offsets = [0, 0], sizes = [8, 32], strides = [1, 1]} : vector<8x128xf32> to vector<8x32xf32>
    %40 = vector.extract_strided_slice %38 {offsets = [0, 32], sizes = [8, 32], strides = [1, 1]} : vector<8x128xf32> to vector<8x32xf32>
    %41 = vector.extract_strided_slice %38 {offsets = [0, 96], sizes = [8, 32], strides = [1, 1]} : vector<8x128xf32> to vector<8x32xf32>
    %42 = vector.extract_strided_slice %33 {offsets = [0, 64], sizes = [8, 32], strides = [1, 1]} : vector<8x128xf32> to vector<8x32xf32>
    %43 = math.tanh %42 : vector<8x32xf32>
    %44 = arith.mulf %40, %27 : vector<8x32xf32>
    %45 = arith.mulf %39, %43 : vector<8x32xf32>
    %46 = arith.addf %44, %45 : vector<8x32xf32>
    %47 = math.tanh %46 : vector<8x32xf32>
    %48 = arith.mulf %41, %47 : vector<8x32xf32>
    %c8_24 = arith.constant 8 : index
    %c0_25 = arith.constant 0 : index
    %49 = vector.load %arg15[%c8_24, %c0_25] : memref<64x32xf32, #tpu.memory_space<vmem>>, vector<8x32xf32>
    tpu.vector_store %arg15[%c8_24, %c0_25], %48 {strides = array<i32>} : memref<64x32xf32, #tpu.memory_space<vmem>>, vector<8x32xf32>,
    %c16 = arith.constant 16 : index
    %c0_26 = arith.constant 0 : index
    %50 = vector.load %arg14[%c16, %c0_26] : memref<64x128xf32, #tpu.memory_space<vmem>>, vector<8x128xf32>
    %cst_27 = arith.constant dense<0.000000e+00> : vector<8x128xf32>
    %51 = tpu.matmul %48, %7, %cst_27 {dimension_numbers = #tpu.dot_dimension_numbers<[1], [0], [0], [1], [0, 0, 1, 1], [], []>} : vector<8x32xf32>, vector<32x128xf32>, vector<8x128xf32> -> vector<8x128xf32>
    %52 = arith.addf %50, %51 : vector<8x128xf32>
    %53 = arith.negf %52 : vector<8x128xf32>
    %54 = math.exp %53 : vector<8x128xf32>
    %cst_28 = arith.constant 1.000000e+00 : f32
    %55 = vector.broadcast %cst_28 : f32 to vector<8x128xf32>
    %56 = arith.addf %55, %54 : vector<8x128xf32>
    %57 = arith.divf %55, %56 : vector<8x128xf32>
    %58 = vector.extract_strided_slice %57 {offsets = [0, 0], sizes = [8, 32], strides = [1, 1]} : vector<8x128xf32> to vector<8x32xf32>
    %59 = vector.extract_strided_slice %57 {offsets = [0, 32], sizes = [8, 32], strides = [1, 1]} : vector<8x128xf32> to vector<8x32xf32>
    %60 = vector.extract_strided_slice %57 {offsets = [0, 96], sizes = [8, 32], strides = [1, 1]} : vector<8x128xf32> to vector<8x32xf32>
    %61 = vector.extract_strided_slice %52 {offsets = [0, 64], sizes = [8, 32], strides = [1, 1]} : vector<8x128xf32> to vector<8x32xf32>
    %62 = math.tanh %61 : vector<8x32xf32>
    %63 = arith.mulf %59, %46 : vector<8x32xf32>
    %64 = arith.mulf %58, %62 : vector<8x32xf32>
    %65 = arith.addf %63, %64 : vector<8x32xf32>
    %66 = math.tanh %65 : vector<8x32xf32>
    %67 = arith.mulf %60, %66 : vector<8x32xf32>
    %c16_29 = arith.constant 16 : index
    %c0_30 = arith.constant 0 : index
    %68 = vector.load %arg15[%c16_29, %c0_30] : memref<64x32xf32, #tpu.memory_space<vmem>>, vector<8x32xf32>
    tpu.vector_store %arg15[%c16_29, %c0_30], %67 {strides = array<i32>} : memref<64x32xf32, #tpu.memory_space<vmem>>, vector<8x32xf32>,
    %c24 = arith.constant 24 : index
    %c0_31 = arith.constant 0 : index
    %69 = vector.load %arg14[%c24, %c0_31] : memref<64x128xf32, #tpu.memory_space<vmem>>, vector<8x128xf32>
    %cst_32 = arith.constant dense<0.000000e+00> : vector<8x128xf32>
    %70 = tpu.matmul %67, %7, %cst_32 {dimension_numbers = #tpu.dot_dimension_numbers<[1], [0], [0], [1], [0, 0, 1, 1], [], []>} : vector<8x32xf32>, vector<32x128xf32>, vector<8x128xf32> -> vector<8x128xf32>
    %71 = arith.addf %69, %70 : vector<8x128xf32>
    %72 = arith.negf %71 : vector<8x128xf32>
    %73 = math.exp %72 : vector<8x128xf32>
    %cst_33 = arith.constant 1.000000e+00 : f32
    %74 = vector.broadcast %cst_33 : f32 to vector<8x128xf32>
    %75 = arith.addf %74, %73 : vector<8x128xf32>
    %76 = arith.divf %74, %75 : vector<8x128xf32>
    %77 = vector.extract_strided_slice %76 {offsets = [0, 0], sizes = [8, 32], strides = [1, 1]} : vector<8x128xf32> to vector<8x32xf32>
    %78 = vector.extract_strided_slice %76 {offsets = [0, 32], sizes = [8, 32], strides = [1, 1]} : vector<8x128xf32> to vector<8x32xf32>
    %79 = vector.extract_strided_slice %76 {offsets = [0, 96], sizes = [8, 32], strides = [1, 1]} : vector<8x128xf32> to vector<8x32xf32>
    %80 = vector.extract_strided_slice %71 {offsets = [0, 64], sizes = [8, 32], strides = [1, 1]} : vector<8x128xf32> to vector<8x32xf32>
    %81 = math.tanh %80 : vector<8x32xf32>
    %82 = arith.mulf %78, %65 : vector<8x32xf32>
    %83 = arith.mulf %77, %81 : vector<8x32xf32>
    %84 = arith.addf %82, %83 : vector<8x32xf32>
    %85 = math.tanh %84 : vector<8x32xf32>
    %86 = arith.mulf %79, %85 : vector<8x32xf32>
    %c24_34 = arith.constant 24 : index
    %c0_35 = arith.constant 0 : index
    %87 = vector.load %arg15[%c24_34, %c0_35] : memref<64x32xf32, #tpu.memory_space<vmem>>, vector<8x32xf32>
    tpu.vector_store %arg15[%c24_34, %c0_35], %86 {strides = array<i32>} : memref<64x32xf32, #tpu.memory_space<vmem>>, vector<8x32xf32>,
    %c32 = arith.constant 32 : index
    %c0_36 = arith.constant 0 : index
    %88 = vector.load %arg14[%c32, %c0_36] : memref<64x128xf32, #tpu.memory_space<vmem>>, vector<8x128xf32>
    %cst_37 = arith.constant dense<0.000000e+00> : vector<8x128xf32>
    %89 = tpu.matmul %86, %7, %cst_37 {dimension_numbers = #tpu.dot_dimension_numbers<[1], [0], [0], [1], [0, 0, 1, 1], [], []>} : vector<8x32xf32>, vector<32x128xf32>, vector<8x128xf32> -> vector<8x128xf32>
    %90 = arith.addf %88, %89 : vector<8x128xf32>
    %91 = arith.negf %90 : vector<8x128xf32>
    %92 = math.exp %91 : vector<8x128xf32>
    %cst_38 = arith.constant 1.000000e+00 : f32
    %93 = vector.broadcast %cst_38 : f32 to vector<8x128xf32>
    %94 = arith.addf %93, %92 : vector<8x128xf32>
    %95 = arith.divf %93, %94 : vector<8x128xf32>
    %96 = vector.extract_strided_slice %95 {offsets = [0, 0], sizes = [8, 32], strides = [1, 1]} : vector<8x128xf32> to vector<8x32xf32>
    %97 = vector.extract_strided_slice %95 {offsets = [0, 32], sizes = [8, 32], strides = [1, 1]} : vector<8x128xf32> to vector<8x32xf32>
    %98 = vector.extract_strided_slice %95 {offsets = [0, 96], sizes = [8, 32], strides = [1, 1]} : vector<8x128xf32> to vector<8x32xf32>
    %99 = vector.extract_strided_slice %90 {offsets = [0, 64], sizes = [8, 32], strides = [1, 1]} : vector<8x128xf32> to vector<8x32xf32>
    %100 = math.tanh %99 : vector<8x32xf32>
    %101 = arith.mulf %97, %84 : vector<8x32xf32>
    %102 = arith.mulf %96, %100 : vector<8x32xf32>
    %103 = arith.addf %101, %102 : vector<8x32xf32>
    %104 = math.tanh %103 : vector<8x32xf32>
    %105 = arith.mulf %98, %104 : vector<8x32xf32>
    %c32_39 = arith.constant 32 : index
    %c0_40 = arith.constant 0 : index
    %106 = vector.load %arg15[%c32_39, %c0_40] : memref<64x32xf32, #tpu.memory_space<vmem>>, vector<8x32xf32>
    tpu.vector_store %arg15[%c32_39, %c0_40], %105 {strides = array<i32>} : memref<64x32xf32, #tpu.memory_space<vmem>>, vector<8x32xf32>,
    %c40 = arith.constant 40 : index
    %c0_41 = arith.constant 0 : index
    %107 = vector.load %arg14[%c40, %c0_41] : memref<64x128xf32, #tpu.memory_space<vmem>>, vector<8x128xf32>
    %cst_42 = arith.constant dense<0.000000e+00> : vector<8x128xf32>
    %108 = tpu.matmul %105, %7, %cst_42 {dimension_numbers = #tpu.dot_dimension_numbers<[1], [0], [0], [1], [0, 0, 1, 1], [], []>} : vector<8x32xf32>, vector<32x128xf32>, vector<8x128xf32> -> vector<8x128xf32>
    %109 = arith.addf %107, %108 : vector<8x128xf32>
    %110 = arith.negf %109 : vector<8x128xf32>
    %111 = math.exp %110 : vector<8x128xf32>
    %cst_43 = arith.constant 1.000000e+00 : f32
    %112 = vector.broadcast %cst_43 : f32 to vector<8x128xf32>
    %113 = arith.addf %112, %111 : vector<8x128xf32>
    %114 = arith.divf %112, %113 : vector<8x128xf32>
    %115 = vector.extract_strided_slice %114 {offsets = [0, 0], sizes = [8, 32], strides = [1, 1]} : vector<8x128xf32> to vector<8x32xf32>
    %116 = vector.extract_strided_slice %114 {offsets = [0, 32], sizes = [8, 32], strides = [1, 1]} : vector<8x128xf32> to vector<8x32xf32>
    %117 = vector.extract_strided_slice %114 {offsets = [0, 96], sizes = [8, 32], strides = [1, 1]} : vector<8x128xf32> to vector<8x32xf32>
    %118 = vector.extract_strided_slice %109 {offsets = [0, 64], sizes = [8, 32], strides = [1, 1]} : vector<8x128xf32> to vector<8x32xf32>
    %119 = math.tanh %118 : vector<8x32xf32>
    %120 = arith.mulf %116, %103 : vector<8x32xf32>
    %121 = arith.mulf %115, %119 : vector<8x32xf32>
    %122 = arith.addf %120, %121 : vector<8x32xf32>
    %123 = math.tanh %122 : vector<8x32xf32>
    %124 = arith.mulf %117, %123 : vector<8x32xf32>
    %c40_44 = arith.constant 40 : index
    %c0_45 = arith.constant 0 : index
    %125 = vector.load %arg15[%c40_44, %c0_45] : memref<64x32xf32, #tpu.memory_space<vmem>>, vector<8x32xf32>
    tpu.vector_store %arg15[%c40_44, %c0_45], %124 {strides = array<i32>} : memref<64x32xf32, #tpu.memory_space<vmem>>, vector<8x32xf32>,
    %c48 = arith.constant 48 : index
    %c0_46 = arith.constant 0 : index
    %126 = vector.load %arg14[%c48, %c0_46] : memref<64x128xf32, #tpu.memory_space<vmem>>, vector<8x128xf32>
    %cst_47 = arith.constant dense<0.000000e+00> : vector<8x128xf32>
    %127 = tpu.matmul %124, %7, %cst_47 {dimension_numbers = #tpu.dot_dimension_numbers<[1], [0], [0], [1], [0, 0, 1, 1], [], []>} : vector<8x32xf32>, vector<32x128xf32>, vector<8x128xf32> -> vector<8x128xf32>
    %128 = arith.addf %126, %127 : vector<8x128xf32>
    %129 = arith.negf %128 : vector<8x128xf32>
    %130 = math.exp %129 : vector<8x128xf32>
    %cst_48 = arith.constant 1.000000e+00 : f32
    %131 = vector.broadcast %cst_48 : f32 to vector<8x128xf32>
    %132 = arith.addf %131, %130 : vector<8x128xf32>
    %133 = arith.divf %131, %132 : vector<8x128xf32>
    %134 = vector.extract_strided_slice %133 {offsets = [0, 0], sizes = [8, 32], strides = [1, 1]} : vector<8x128xf32> to vector<8x32xf32>
    %135 = vector.extract_strided_slice %133 {offsets = [0, 32], sizes = [8, 32], strides = [1, 1]} : vector<8x128xf32> to vector<8x32xf32>
    %136 = vector.extract_strided_slice %133 {offsets = [0, 96], sizes = [8, 32], strides = [1, 1]} : vector<8x128xf32> to vector<8x32xf32>
    %137 = vector.extract_strided_slice %128 {offsets = [0, 64], sizes = [8, 32], strides = [1, 1]} : vector<8x128xf32> to vector<8x32xf32>
    %138 = math.tanh %137 : vector<8x32xf32>
    %139 = arith.mulf %135, %122 : vector<8x32xf32>
    %140 = arith.mulf %134, %138 : vector<8x32xf32>
    %141 = arith.addf %139, %140 : vector<8x32xf32>
    %142 = math.tanh %141 : vector<8x32xf32>
    %143 = arith.mulf %136, %142 : vector<8x32xf32>
    %c48_49 = arith.constant 48 : index
    %c0_50 = arith.constant 0 : index
    %144 = vector.load %arg15[%c48_49, %c0_50] : memref<64x32xf32, #tpu.memory_space<vmem>>, vector<8x32xf32>
    tpu.vector_store %arg15[%c48_49, %c0_50], %143 {strides = array<i32>} : memref<64x32xf32, #tpu.memory_space<vmem>>, vector<8x32xf32>,
    %c56 = arith.constant 56 : index
    %c0_51 = arith.constant 0 : index
    %145 = vector.load %arg14[%c56, %c0_51] : memref<64x128xf32, #tpu.memory_space<vmem>>, vector<8x128xf32>
    %cst_52 = arith.constant dense<0.000000e+00> : vector<8x128xf32>
    %146 = tpu.matmul %143, %7, %cst_52 {dimension_numbers = #tpu.dot_dimension_numbers<[1], [0], [0], [1], [0, 0, 1, 1], [], []>} : vector<8x32xf32>, vector<32x128xf32>, vector<8x128xf32> -> vector<8x128xf32>
    %147 = arith.addf %145, %146 : vector<8x128xf32>
    %148 = arith.negf %147 : vector<8x128xf32>
    %149 = math.exp %148 : vector<8x128xf32>
    %cst_53 = arith.constant 1.000000e+00 : f32
    %150 = vector.broadcast %cst_53 : f32 to vector<8x128xf32>
    %151 = arith.addf %150, %149 : vector<8x128xf32>
    %152 = arith.divf %150, %151 : vector<8x128xf32>
    %153 = vector.extract_strided_slice %152 {offsets = [0, 0], sizes = [8, 32], strides = [1, 1]} : vector<8x128xf32> to vector<8x32xf32>
    %154 = vector.extract_strided_slice %152 {offsets = [0, 32], sizes = [8, 32], strides = [1, 1]} : vector<8x128xf32> to vector<8x32xf32>
    %155 = vector.extract_strided_slice %152 {offsets = [0, 96], sizes = [8, 32], strides = [1, 1]} : vector<8x128xf32> to vector<8x32xf32>
    %156 = vector.extract_strided_slice %147 {offsets = [0, 64], sizes = [8, 32], strides = [1, 1]} : vector<8x128xf32> to vector<8x32xf32>
    %157 = math.tanh %156 : vector<8x32xf32>
    %158 = arith.mulf %154, %141 : vector<8x32xf32>
    %159 = arith.mulf %153, %157 : vector<8x32xf32>
    %160 = arith.addf %158, %159 : vector<8x32xf32>
    %161 = math.tanh %160 : vector<8x32xf32>
    %162 = arith.mulf %155, %161 : vector<8x32xf32>
    %c56_54 = arith.constant 56 : index
    %c0_55 = arith.constant 0 : index
    %163 = vector.load %arg15[%c56_54, %c0_55] : memref<64x32xf32, #tpu.memory_space<vmem>>, vector<8x32xf32>
    tpu.vector_store %arg15[%c56_54, %c0_55], %162 {strides = array<i32>} : memref<64x32xf32, #tpu.memory_space<vmem>>, vector<8x32xf32>,
    %c0_56 = arith.constant 0 : index
    %c0_57 = arith.constant 0 : index
    %c0_58 = arith.constant 0 : index
    %164 = vector.load %arg12[%c0_56, %c0_57, %c0_58] : memref<2x8x32xf32, #tpu.memory_space<vmem>>, vector<1x8x32xf32>
    %165 = vector.shape_cast %164 : vector<1x8x32xf32> to vector<8x32xf32>
    %166 = vector.shape_cast %162 : vector<8x32xf32> to vector<1x8x32xf32>
    tpu.vector_store %arg12[%c0_56, %c0_57, %c0_58], %166 {strides = array<i32>} : memref<2x8x32xf32, #tpu.memory_space<vmem>>, vector<1x8x32xf32>,
    %c0_59 = arith.constant 0 : index
    %c0_60 = arith.constant 0 : index
    %c0_61 = arith.constant 0 : index
    %167 = vector.load %arg13[%c0_59, %c0_60, %c0_61] : memref<2x8x32xf32, #tpu.memory_space<vmem>>, vector<1x8x32xf32>
    %168 = vector.shape_cast %167 : vector<1x8x32xf32> to vector<8x32xf32>
    %169 = vector.shape_cast %160 : vector<8x32xf32> to vector<1x8x32xf32>
    tpu.vector_store %arg13[%c0_59, %c0_60, %c0_61], %169 {strides = array<i32>} : memref<2x8x32xf32, #tpu.memory_space<vmem>>, vector<1x8x32xf32>,
    %c0_62 = arith.constant 0 : index
    %c0_63 = arith.constant 0 : index
    %170 = vector.load %arg15[%c0_62, %c0_63] : memref<64x32xf32, #tpu.memory_space<vmem>>, vector<64x32xf32>
    %c0_64 = arith.constant 0 : index
    %c0_65 = arith.constant 0 : index
    %171 = vector.load %arg6[%c0_64, %c0_65] : memref<32x128xf32, #tpu.memory_space<vmem>>, vector<32x128xf32>
    %cst_66 = arith.constant dense<0.000000e+00> : vector<64x128xf32>
    %172 = tpu.matmul %170, %171, %cst_66 {dimension_numbers = #tpu.dot_dimension_numbers<[1], [0], [0], [1], [0, 0, 1, 1], [], []>} : vector<64x32xf32>, vector<32x128xf32>, vector<64x128xf32> -> vector<64x128xf32>
    %c0_67 = arith.constant 0 : index
    %c0_68 = arith.constant 0 : index
    %173 = vector.load %arg8[%c0_67, %c0_68] : memref<1x128xf32, #tpu.memory_space<vmem>>, vector<1x128xf32>
    %174 = vector.broadcast %173 : vector<1x128xf32> to vector<64x128xf32>
    %175 = arith.addf %172, %174 : vector<64x128xf32>
    %c0_69 = arith.constant 0 : index
    %c0_70 = arith.constant 0 : index
    %176 = vector.load %arg14[%c0_69, %c0_70] : memref<64x128xf32, #tpu.memory_space<vmem>>, vector<64x128xf32>
    tpu.vector_store %arg14[%c0_69, %c0_70], %175 {strides = array<i32>} : memref<64x128xf32, #tpu.memory_space<vmem>>, vector<64x128xf32>,
    %c0_71 = arith.constant 0 : index
    %c0_72 = arith.constant 0 : index
    %177 = vector.load %arg7[%c0_71, %c0_72] : memref<32x128xf32, #tpu.memory_space<vmem>>, vector<32x128xf32>
    %c1 = arith.constant 1 : index
    %c0_73 = arith.constant 0 : index
    %c0_74 = arith.constant 0 : index
    %178 = vector.load %arg1[%c1, %c0_73, %c0_74] : memref<2x8x32xf32, #tpu.memory_space<vmem>>, vector<1x8x32xf32>
    %179 = vector.shape_cast %178 : vector<1x8x32xf32> to vector<8x32xf32>
    %c1_75 = arith.constant 1 : index
    %c0_76 = arith.constant 0 : index
    %c0_77 = arith.constant 0 : index
    %180 = vector.load %arg2[%c1_75, %c0_76, %c0_77] : memref<2x8x32xf32, #tpu.memory_space<vmem>>, vector<1x8x32xf32>
    %181 = vector.shape_cast %180 : vector<1x8x32xf32> to vector<8x32xf32>
    %c0_78 = arith.constant 0 : index
    %c0_79 = arith.constant 0 : index
    %182 = vector.load %arg14[%c0_78, %c0_79] : memref<64x128xf32, #tpu.memory_space<vmem>>, vector<8x128xf32>
    %cst_80 = arith.constant dense<0.000000e+00> : vector<8x128xf32>
    %183 = tpu.matmul %179, %177, %cst_80 {dimension_numbers = #tpu.dot_dimension_numbers<[1], [0], [0], [1], [0, 0, 1, 1], [], []>} : vector<8x32xf32>, vector<32x128xf32>, vector<8x128xf32> -> vector<8x128xf32>
    %184 = arith.addf %182, %183 : vector<8x128xf32>
    %185 = arith.negf %184 : vector<8x128xf32>
    %186 = math.exp %185 : vector<8x128xf32>
    %cst_81 = arith.constant 1.000000e+00 : f32
    %187 = vector.broadcast %cst_81 : f32 to vector<8x128xf32>
    %188 = arith.addf %187, %186 : vector<8x128xf32>
    %189 = arith.divf %187, %188 : vector<8x128xf32>
    %190 = vector.extract_strided_slice %189 {offsets = [0, 0], sizes = [8, 32], strides = [1, 1]} : vector<8x128xf32> to vector<8x32xf32>
    %191 = vector.extract_strided_slice %189 {offsets = [0, 32], sizes = [8, 32], strides = [1, 1]} : vector<8x128xf32> to vector<8x32xf32>
    %192 = vector.extract_strided_slice %189 {offsets = [0, 96], sizes = [8, 32], strides = [1, 1]} : vector<8x128xf32> to vector<8x32xf32>
    %193 = vector.extract_strided_slice %184 {offsets = [0, 64], sizes = [8, 32], strides = [1, 1]} : vector<8x128xf32> to vector<8x32xf32>
    %194 = math.tanh %193 : vector<8x32xf32>
    %195 = arith.mulf %191, %181 : vector<8x32xf32>
    %196 = arith.mulf %190, %194 : vector<8x32xf32>
    %197 = arith.addf %195, %196 : vector<8x32xf32>
    %198 = math.tanh %197 : vector<8x32xf32>
    %199 = arith.mulf %192, %198 : vector<8x32xf32>
    %c0_82 = arith.constant 0 : index
    %c0_83 = arith.constant 0 : index
    %200 = vector.load %arg15[%c0_82, %c0_83] : memref<64x32xf32, #tpu.memory_space<vmem>>, vector<8x32xf32>
    tpu.vector_store %arg15[%c0_82, %c0_83], %199 {strides = array<i32>} : memref<64x32xf32, #tpu.memory_space<vmem>>, vector<8x32xf32>,
    %c8_84 = arith.constant 8 : index
    %c0_85 = arith.constant 0 : index
    %201 = vector.load %arg14[%c8_84, %c0_85] : memref<64x128xf32, #tpu.memory_space<vmem>>, vector<8x128xf32>
    %cst_86 = arith.constant dense<0.000000e+00> : vector<8x128xf32>
    %202 = tpu.matmul %199, %177, %cst_86 {dimension_numbers = #tpu.dot_dimension_numbers<[1], [0], [0], [1], [0, 0, 1, 1], [], []>} : vector<8x32xf32>, vector<32x128xf32>, vector<8x128xf32> -> vector<8x128xf32>
    %203 = arith.addf %201, %202 : vector<8x128xf32>
    %204 = arith.negf %203 : vector<8x128xf32>
    %205 = math.exp %204 : vector<8x128xf32>
    %cst_87 = arith.constant 1.000000e+00 : f32
    %206 = vector.broadcast %cst_87 : f32 to vector<8x128xf32>
    %207 = arith.addf %206, %205 : vector<8x128xf32>
    %208 = arith.divf %206, %207 : vector<8x128xf32>
    %209 = vector.extract_strided_slice %208 {offsets = [0, 0], sizes = [8, 32], strides = [1, 1]} : vector<8x128xf32> to vector<8x32xf32>
    %210 = vector.extract_strided_slice %208 {offsets = [0, 32], sizes = [8, 32], strides = [1, 1]} : vector<8x128xf32> to vector<8x32xf32>
    %211 = vector.extract_strided_slice %208 {offsets = [0, 96], sizes = [8, 32], strides = [1, 1]} : vector<8x128xf32> to vector<8x32xf32>
    %212 = vector.extract_strided_slice %203 {offsets = [0, 64], sizes = [8, 32], strides = [1, 1]} : vector<8x128xf32> to vector<8x32xf32>
    %213 = math.tanh %212 : vector<8x32xf32>
    %214 = arith.mulf %210, %197 : vector<8x32xf32>
    %215 = arith.mulf %209, %213 : vector<8x32xf32>
    %216 = arith.addf %214, %215 : vector<8x32xf32>
    %217 = math.tanh %216 : vector<8x32xf32>
    %218 = arith.mulf %211, %217 : vector<8x32xf32>
    %c8_88 = arith.constant 8 : index
    %c0_89 = arith.constant 0 : index
    %219 = vector.load %arg15[%c8_88, %c0_89] : memref<64x32xf32, #tpu.memory_space<vmem>>, vector<8x32xf32>
    tpu.vector_store %arg15[%c8_88, %c0_89], %218 {strides = array<i32>} : memref<64x32xf32, #tpu.memory_space<vmem>>, vector<8x32xf32>,
    %c16_90 = arith.constant 16 : index
    %c0_91 = arith.constant 0 : index
    %220 = vector.load %arg14[%c16_90, %c0_91] : memref<64x128xf32, #tpu.memory_space<vmem>>, vector<8x128xf32>
    %cst_92 = arith.constant dense<0.000000e+00> : vector<8x128xf32>
    %221 = tpu.matmul %218, %177, %cst_92 {dimension_numbers = #tpu.dot_dimension_numbers<[1], [0], [0], [1], [0, 0, 1, 1], [], []>} : vector<8x32xf32>, vector<32x128xf32>, vector<8x128xf32> -> vector<8x128xf32>
    %222 = arith.addf %220, %221 : vector<8x128xf32>
    %223 = arith.negf %222 : vector<8x128xf32>
    %224 = math.exp %223 : vector<8x128xf32>
    %cst_93 = arith.constant 1.000000e+00 : f32
    %225 = vector.broadcast %cst_93 : f32 to vector<8x128xf32>
    %226 = arith.addf %225, %224 : vector<8x128xf32>
    %227 = arith.divf %225, %226 : vector<8x128xf32>
    %228 = vector.extract_strided_slice %227 {offsets = [0, 0], sizes = [8, 32], strides = [1, 1]} : vector<8x128xf32> to vector<8x32xf32>
    %229 = vector.extract_strided_slice %227 {offsets = [0, 32], sizes = [8, 32], strides = [1, 1]} : vector<8x128xf32> to vector<8x32xf32>
    %230 = vector.extract_strided_slice %227 {offsets = [0, 96], sizes = [8, 32], strides = [1, 1]} : vector<8x128xf32> to vector<8x32xf32>
    %231 = vector.extract_strided_slice %222 {offsets = [0, 64], sizes = [8, 32], strides = [1, 1]} : vector<8x128xf32> to vector<8x32xf32>
    %232 = math.tanh %231 : vector<8x32xf32>
    %233 = arith.mulf %229, %216 : vector<8x32xf32>
    %234 = arith.mulf %228, %232 : vector<8x32xf32>
    %235 = arith.addf %233, %234 : vector<8x32xf32>
    %236 = math.tanh %235 : vector<8x32xf32>
    %237 = arith.mulf %230, %236 : vector<8x32xf32>
    %c16_94 = arith.constant 16 : index
    %c0_95 = arith.constant 0 : index
    %238 = vector.load %arg15[%c16_94, %c0_95] : memref<64x32xf32, #tpu.memory_space<vmem>>, vector<8x32xf32>
    tpu.vector_store %arg15[%c16_94, %c0_95], %237 {strides = array<i32>} : memref<64x32xf32, #tpu.memory_space<vmem>>, vector<8x32xf32>,
    %c24_96 = arith.constant 24 : index
    %c0_97 = arith.constant 0 : index
    %239 = vector.load %arg14[%c24_96, %c0_97] : memref<64x128xf32, #tpu.memory_space<vmem>>, vector<8x128xf32>
    %cst_98 = arith.constant dense<0.000000e+00> : vector<8x128xf32>
    %240 = tpu.matmul %237, %177, %cst_98 {dimension_numbers = #tpu.dot_dimension_numbers<[1], [0], [0], [1], [0, 0, 1, 1], [], []>} : vector<8x32xf32>, vector<32x128xf32>, vector<8x128xf32> -> vector<8x128xf32>
    %241 = arith.addf %239, %240 : vector<8x128xf32>
    %242 = arith.negf %241 : vector<8x128xf32>
    %243 = math.exp %242 : vector<8x128xf32>
    %cst_99 = arith.constant 1.000000e+00 : f32
    %244 = vector.broadcast %cst_99 : f32 to vector<8x128xf32>
    %245 = arith.addf %244, %243 : vector<8x128xf32>
    %246 = arith.divf %244, %245 : vector<8x128xf32>
    %247 = vector.extract_strided_slice %246 {offsets = [0, 0], sizes = [8, 32], strides = [1, 1]} : vector<8x128xf32> to vector<8x32xf32>
    %248 = vector.extract_strided_slice %246 {offsets = [0, 32], sizes = [8, 32], strides = [1, 1]} : vector<8x128xf32> to vector<8x32xf32>
    %249 = vector.extract_strided_slice %246 {offsets = [0, 96], sizes = [8, 32], strides = [1, 1]} : vector<8x128xf32> to vector<8x32xf32>
    %250 = vector.extract_strided_slice %241 {offsets = [0, 64], sizes = [8, 32], strides = [1, 1]} : vector<8x128xf32> to vector<8x32xf32>
    %251 = math.tanh %250 : vector<8x32xf32>
    %252 = arith.mulf %248, %235 : vector<8x32xf32>
    %253 = arith.mulf %247, %251 : vector<8x32xf32>
    %254 = arith.addf %252, %253 : vector<8x32xf32>
    %255 = math.tanh %254 : vector<8x32xf32>
    %256 = arith.mulf %249, %255 : vector<8x32xf32>
    %c24_100 = arith.constant 24 : index
    %c0_101 = arith.constant 0 : index
    %257 = vector.load %arg15[%c24_100, %c0_101] : memref<64x32xf32, #tpu.memory_space<vmem>>, vector<8x32xf32>
    tpu.vector_store %arg15[%c24_100, %c0_101], %256 {strides = array<i32>} : memref<64x32xf32, #tpu.memory_space<vmem>>, vector<8x32xf32>,
    %c32_102 = arith.constant 32 : index
    %c0_103 = arith.constant 0 : index
    %258 = vector.load %arg14[%c32_102, %c0_103] : memref<64x128xf32, #tpu.memory_space<vmem>>, vector<8x128xf32>
    %cst_104 = arith.constant dense<0.000000e+00> : vector<8x128xf32>
    %259 = tpu.matmul %256, %177, %cst_104 {dimension_numbers = #tpu.dot_dimension_numbers<[1], [0], [0], [1], [0, 0, 1, 1], [], []>} : vector<8x32xf32>, vector<32x128xf32>, vector<8x128xf32> -> vector<8x128xf32>
    %260 = arith.addf %258, %259 : vector<8x128xf32>
    %261 = arith.negf %260 : vector<8x128xf32>
    %262 = math.exp %261 : vector<8x128xf32>
    %cst_105 = arith.constant 1.000000e+00 : f32
    %263 = vector.broadcast %cst_105 : f32 to vector<8x128xf32>
    %264 = arith.addf %263, %262 : vector<8x128xf32>
    %265 = arith.divf %263, %264 : vector<8x128xf32>
    %266 = vector.extract_strided_slice %265 {offsets = [0, 0], sizes = [8, 32], strides = [1, 1]} : vector<8x128xf32> to vector<8x32xf32>
    %267 = vector.extract_strided_slice %265 {offsets = [0, 32], sizes = [8, 32], strides = [1, 1]} : vector<8x128xf32> to vector<8x32xf32>
    %268 = vector.extract_strided_slice %265 {offsets = [0, 96], sizes = [8, 32], strides = [1, 1]} : vector<8x128xf32> to vector<8x32xf32>
    %269 = vector.extract_strided_slice %260 {offsets = [0, 64], sizes = [8, 32], strides = [1, 1]} : vector<8x128xf32> to vector<8x32xf32>
    %270 = math.tanh %269 : vector<8x32xf32>
    %271 = arith.mulf %267, %254 : vector<8x32xf32>
    %272 = arith.mulf %266, %270 : vector<8x32xf32>
    %273 = arith.addf %271, %272 : vector<8x32xf32>
    %274 = math.tanh %273 : vector<8x32xf32>
    %275 = arith.mulf %268, %274 : vector<8x32xf32>
    %c32_106 = arith.constant 32 : index
    %c0_107 = arith.constant 0 : index
    %276 = vector.load %arg15[%c32_106, %c0_107] : memref<64x32xf32, #tpu.memory_space<vmem>>, vector<8x32xf32>
    tpu.vector_store %arg15[%c32_106, %c0_107], %275 {strides = array<i32>} : memref<64x32xf32, #tpu.memory_space<vmem>>, vector<8x32xf32>,
    %c40_108 = arith.constant 40 : index
    %c0_109 = arith.constant 0 : index
    %277 = vector.load %arg14[%c40_108, %c0_109] : memref<64x128xf32, #tpu.memory_space<vmem>>, vector<8x128xf32>
    %cst_110 = arith.constant dense<0.000000e+00> : vector<8x128xf32>
    %278 = tpu.matmul %275, %177, %cst_110 {dimension_numbers = #tpu.dot_dimension_numbers<[1], [0], [0], [1], [0, 0, 1, 1], [], []>} : vector<8x32xf32>, vector<32x128xf32>, vector<8x128xf32> -> vector<8x128xf32>
    %279 = arith.addf %277, %278 : vector<8x128xf32>
    %280 = arith.negf %279 : vector<8x128xf32>
    %281 = math.exp %280 : vector<8x128xf32>
    %cst_111 = arith.constant 1.000000e+00 : f32
    %282 = vector.broadcast %cst_111 : f32 to vector<8x128xf32>
    %283 = arith.addf %282, %281 : vector<8x128xf32>
    %284 = arith.divf %282, %283 : vector<8x128xf32>
    %285 = vector.extract_strided_slice %284 {offsets = [0, 0], sizes = [8, 32], strides = [1, 1]} : vector<8x128xf32> to vector<8x32xf32>
    %286 = vector.extract_strided_slice %284 {offsets = [0, 32], sizes = [8, 32], strides = [1, 1]} : vector<8x128xf32> to vector<8x32xf32>
    %287 = vector.extract_strided_slice %284 {offsets = [0, 96], sizes = [8, 32], strides = [1, 1]} : vector<8x128xf32> to vector<8x32xf32>
    %288 = vector.extract_strided_slice %279 {offsets = [0, 64], sizes = [8, 32], strides = [1, 1]} : vector<8x128xf32> to vector<8x32xf32>
    %289 = math.tanh %288 : vector<8x32xf32>
    %290 = arith.mulf %286, %273 : vector<8x32xf32>
    %291 = arith.mulf %285, %289 : vector<8x32xf32>
    %292 = arith.addf %290, %291 : vector<8x32xf32>
    %293 = math.tanh %292 : vector<8x32xf32>
    %294 = arith.mulf %287, %293 : vector<8x32xf32>
    %c40_112 = arith.constant 40 : index
    %c0_113 = arith.constant 0 : index
    %295 = vector.load %arg15[%c40_112, %c0_113] : memref<64x32xf32, #tpu.memory_space<vmem>>, vector<8x32xf32>
    tpu.vector_store %arg15[%c40_112, %c0_113], %294 {strides = array<i32>} : memref<64x32xf32, #tpu.memory_space<vmem>>, vector<8x32xf32>,
    %c48_114 = arith.constant 48 : index
    %c0_115 = arith.constant 0 : index
    %296 = vector.load %arg14[%c48_114, %c0_115] : memref<64x128xf32, #tpu.memory_space<vmem>>, vector<8x128xf32>
    %cst_116 = arith.constant dense<0.000000e+00> : vector<8x128xf32>
    %297 = tpu.matmul %294, %177, %cst_116 {dimension_numbers = #tpu.dot_dimension_numbers<[1], [0], [0], [1], [0, 0, 1, 1], [], []>} : vector<8x32xf32>, vector<32x128xf32>, vector<8x128xf32> -> vector<8x128xf32>
    %298 = arith.addf %296, %297 : vector<8x128xf32>
    %299 = arith.negf %298 : vector<8x128xf32>
    %300 = math.exp %299 : vector<8x128xf32>
    %cst_117 = arith.constant 1.000000e+00 : f32
    %301 = vector.broadcast %cst_117 : f32 to vector<8x128xf32>
    %302 = arith.addf %301, %300 : vector<8x128xf32>
    %303 = arith.divf %301, %302 : vector<8x128xf32>
    %304 = vector.extract_strided_slice %303 {offsets = [0, 0], sizes = [8, 32], strides = [1, 1]} : vector<8x128xf32> to vector<8x32xf32>
    %305 = vector.extract_strided_slice %303 {offsets = [0, 32], sizes = [8, 32], strides = [1, 1]} : vector<8x128xf32> to vector<8x32xf32>
    %306 = vector.extract_strided_slice %303 {offsets = [0, 96], sizes = [8, 32], strides = [1, 1]} : vector<8x128xf32> to vector<8x32xf32>
    %307 = vector.extract_strided_slice %298 {offsets = [0, 64], sizes = [8, 32], strides = [1, 1]} : vector<8x128xf32> to vector<8x32xf32>
    %308 = math.tanh %307 : vector<8x32xf32>
    %309 = arith.mulf %305, %292 : vector<8x32xf32>
    %310 = arith.mulf %304, %308 : vector<8x32xf32>
    %311 = arith.addf %309, %310 : vector<8x32xf32>
    %312 = math.tanh %311 : vector<8x32xf32>
    %313 = arith.mulf %306, %312 : vector<8x32xf32>
    %c48_118 = arith.constant 48 : index
    %c0_119 = arith.constant 0 : index
    %314 = vector.load %arg15[%c48_118, %c0_119] : memref<64x32xf32, #tpu.memory_space<vmem>>, vector<8x32xf32>
    tpu.vector_store %arg15[%c48_118, %c0_119], %313 {strides = array<i32>} : memref<64x32xf32, #tpu.memory_space<vmem>>, vector<8x32xf32>,
    %c56_120 = arith.constant 56 : index
    %c0_121 = arith.constant 0 : index
    %315 = vector.load %arg14[%c56_120, %c0_121] : memref<64x128xf32, #tpu.memory_space<vmem>>, vector<8x128xf32>
    %cst_122 = arith.constant dense<0.000000e+00> : vector<8x128xf32>
    %316 = tpu.matmul %313, %177, %cst_122 {dimension_numbers = #tpu.dot_dimension_numbers<[1], [0], [0], [1], [0, 0, 1, 1], [], []>} : vector<8x32xf32>, vector<32x128xf32>, vector<8x128xf32> -> vector<8x128xf32>
    %317 = arith.addf %315, %316 : vector<8x128xf32>
    %318 = arith.negf %317 : vector<8x128xf32>
    %319 = math.exp %318 : vector<8x128xf32>
    %cst_123 = arith.constant 1.000000e+00 : f32
    %320 = vector.broadcast %cst_123 : f32 to vector<8x128xf32>
    %321 = arith.addf %320, %319 : vector<8x128xf32>
    %322 = arith.divf %320, %321 : vector<8x128xf32>
    %323 = vector.extract_strided_slice %322 {offsets = [0, 0], sizes = [8, 32], strides = [1, 1]} : vector<8x128xf32> to vector<8x32xf32>
    %324 = vector.extract_strided_slice %322 {offsets = [0, 32], sizes = [8, 32], strides = [1, 1]} : vector<8x128xf32> to vector<8x32xf32>
    %325 = vector.extract_strided_slice %322 {offsets = [0, 96], sizes = [8, 32], strides = [1, 1]} : vector<8x128xf32> to vector<8x32xf32>
    %326 = vector.extract_strided_slice %317 {offsets = [0, 64], sizes = [8, 32], strides = [1, 1]} : vector<8x128xf32> to vector<8x32xf32>
    %327 = math.tanh %326 : vector<8x32xf32>
    %328 = arith.mulf %324, %311 : vector<8x32xf32>
    %329 = arith.mulf %323, %327 : vector<8x32xf32>
    %330 = arith.addf %328, %329 : vector<8x32xf32>
    %331 = math.tanh %330 : vector<8x32xf32>
    %332 = arith.mulf %325, %331 : vector<8x32xf32>
    %c56_124 = arith.constant 56 : index
    %c0_125 = arith.constant 0 : index
    %333 = vector.load %arg15[%c56_124, %c0_125] : memref<64x32xf32, #tpu.memory_space<vmem>>, vector<8x32xf32>
    tpu.vector_store %arg15[%c56_124, %c0_125], %332 {strides = array<i32>} : memref<64x32xf32, #tpu.memory_space<vmem>>, vector<8x32xf32>,
    %c1_126 = arith.constant 1 : index
    %c0_127 = arith.constant 0 : index
    %c0_128 = arith.constant 0 : index
    %334 = vector.load %arg12[%c1_126, %c0_127, %c0_128] : memref<2x8x32xf32, #tpu.memory_space<vmem>>, vector<1x8x32xf32>
    %335 = vector.shape_cast %334 : vector<1x8x32xf32> to vector<8x32xf32>
    %336 = vector.shape_cast %332 : vector<8x32xf32> to vector<1x8x32xf32>
    tpu.vector_store %arg12[%c1_126, %c0_127, %c0_128], %336 {strides = array<i32>} : memref<2x8x32xf32, #tpu.memory_space<vmem>>, vector<1x8x32xf32>,
    %c1_129 = arith.constant 1 : index
    %c0_130 = arith.constant 0 : index
    %c0_131 = arith.constant 0 : index
    %337 = vector.load %arg13[%c1_129, %c0_130, %c0_131] : memref<2x8x32xf32, #tpu.memory_space<vmem>>, vector<1x8x32xf32>
    %338 = vector.shape_cast %337 : vector<1x8x32xf32> to vector<8x32xf32>
    %339 = vector.shape_cast %330 : vector<8x32xf32> to vector<1x8x32xf32>
    tpu.vector_store %arg13[%c1_129, %c0_130, %c0_131], %339 {strides = array<i32>} : memref<2x8x32xf32, #tpu.memory_space<vmem>>, vector<1x8x32xf32>,
    %c0_132 = arith.constant 0 : index
    %c0_133 = arith.constant 0 : index
    %340 = vector.load %arg9[%c0_132, %c0_133] : memref<32x1xf32, #tpu.memory_space<vmem>>, vector<32x1xf32>
    %c0_134 = arith.constant 0 : index
    %c0_135 = arith.constant 0 : index
    %341 = vector.load %arg10[%c0_134, %c0_135] : memref<1x1xf32, #tpu.memory_space<vmem>>, vector<1x1xf32>
    %c24_136 = arith.constant 24 : index
    %c0_137 = arith.constant 0 : index
    %342 = vector.load %arg15[%c24_136, %c0_137] : memref<64x32xf32, #tpu.memory_space<vmem>>, vector<8x32xf32>
    %cst_138 = arith.constant dense<0.000000e+00> : vector<8x1xf32>
    %343 = tpu.matmul %342, %340, %cst_138 {dimension_numbers = #tpu.dot_dimension_numbers<[1], [0], [0], [1], [0, 0, 1, 1], [], []>} : vector<8x32xf32>, vector<32x1xf32>, vector<8x1xf32> -> vector<8x1xf32>
    %344 = vector.broadcast %341 : vector<1x1xf32> to vector<8x1xf32>
    %345 = arith.addf %343, %344 : vector<8x1xf32>
    %346 = arith.negf %345 : vector<8x1xf32>
    %347 = math.exp %346 : vector<8x1xf32>
    %cst_139 = arith.constant 1.000000e+00 : f32
    %348 = vector.broadcast %cst_139 : f32 to vector<8x1xf32>
    %349 = arith.addf %348, %347 : vector<8x1xf32>
    %350 = arith.divf %348, %349 : vector<8x1xf32>
    %c0_140 = arith.constant 0 : index
    %c0_141 = arith.constant 0 : index
    %351 = vector.load %arg11[%c0_140, %c0_141] : memref<8x5xf32, #tpu.memory_space<vmem>>, vector<8x1xf32>
    tpu.vector_store %arg11[%c0_140, %c0_141], %350 {strides = array<i32>} : memref<8x5xf32, #tpu.memory_space<vmem>>, vector<8x1xf32>,
    %c32_142 = arith.constant 32 : index
    %c0_143 = arith.constant 0 : index
    %352 = vector.load %arg15[%c32_142, %c0_143] : memref<64x32xf32, #tpu.memory_space<vmem>>, vector<8x32xf32>
    %cst_144 = arith.constant dense<0.000000e+00> : vector<8x1xf32>
    %353 = tpu.matmul %352, %340, %cst_144 {dimension_numbers = #tpu.dot_dimension_numbers<[1], [0], [0], [1], [0, 0, 1, 1], [], []>} : vector<8x32xf32>, vector<32x1xf32>, vector<8x1xf32> -> vector<8x1xf32>
    %354 = vector.broadcast %341 : vector<1x1xf32> to vector<8x1xf32>
    %355 = arith.addf %353, %354 : vector<8x1xf32>
    %356 = arith.negf %355 : vector<8x1xf32>
    %357 = math.exp %356 : vector<8x1xf32>
    %cst_145 = arith.constant 1.000000e+00 : f32
    %358 = vector.broadcast %cst_145 : f32 to vector<8x1xf32>
    %359 = arith.addf %358, %357 : vector<8x1xf32>
    %360 = arith.divf %358, %359 : vector<8x1xf32>
    %c0_146 = arith.constant 0 : index
    %c1_147 = arith.constant 1 : index
    %361 = vector.load %arg11[%c0_146, %c1_147] : memref<8x5xf32, #tpu.memory_space<vmem>>, vector<8x1xf32>
    tpu.vector_store %arg11[%c0_146, %c1_147], %360 {strides = array<i32>} : memref<8x5xf32, #tpu.memory_space<vmem>>, vector<8x1xf32>,
    %c40_148 = arith.constant 40 : index
    %c0_149 = arith.constant 0 : index
    %362 = vector.load %arg15[%c40_148, %c0_149] : memref<64x32xf32, #tpu.memory_space<vmem>>, vector<8x32xf32>
    %cst_150 = arith.constant dense<0.000000e+00> : vector<8x1xf32>
    %363 = tpu.matmul %362, %340, %cst_150 {dimension_numbers = #tpu.dot_dimension_numbers<[1], [0], [0], [1], [0, 0, 1, 1], [], []>} : vector<8x32xf32>, vector<32x1xf32>, vector<8x1xf32> -> vector<8x1xf32>
    %364 = vector.broadcast %341 : vector<1x1xf32> to vector<8x1xf32>
    %365 = arith.addf %363, %364 : vector<8x1xf32>
    %366 = arith.negf %365 : vector<8x1xf32>
    %367 = math.exp %366 : vector<8x1xf32>
    %cst_151 = arith.constant 1.000000e+00 : f32
    %368 = vector.broadcast %cst_151 : f32 to vector<8x1xf32>
    %369 = arith.addf %368, %367 : vector<8x1xf32>
    %370 = arith.divf %368, %369 : vector<8x1xf32>
    %c0_152 = arith.constant 0 : index
    %c2 = arith.constant 2 : index
    %371 = vector.load %arg11[%c0_152, %c2] : memref<8x5xf32, #tpu.memory_space<vmem>>, vector<8x1xf32>
    tpu.vector_store %arg11[%c0_152, %c2], %370 {strides = array<i32>} : memref<8x5xf32, #tpu.memory_space<vmem>>, vector<8x1xf32>,
    %c48_153 = arith.constant 48 : index
    %c0_154 = arith.constant 0 : index
    %372 = vector.load %arg15[%c48_153, %c0_154] : memref<64x32xf32, #tpu.memory_space<vmem>>, vector<8x32xf32>
    %cst_155 = arith.constant dense<0.000000e+00> : vector<8x1xf32>
    %373 = tpu.matmul %372, %340, %cst_155 {dimension_numbers = #tpu.dot_dimension_numbers<[1], [0], [0], [1], [0, 0, 1, 1], [], []>} : vector<8x32xf32>, vector<32x1xf32>, vector<8x1xf32> -> vector<8x1xf32>
    %374 = vector.broadcast %341 : vector<1x1xf32> to vector<8x1xf32>
    %375 = arith.addf %373, %374 : vector<8x1xf32>
    %376 = arith.negf %375 : vector<8x1xf32>
    %377 = math.exp %376 : vector<8x1xf32>
    %cst_156 = arith.constant 1.000000e+00 : f32
    %378 = vector.broadcast %cst_156 : f32 to vector<8x1xf32>
    %379 = arith.addf %378, %377 : vector<8x1xf32>
    %380 = arith.divf %378, %379 : vector<8x1xf32>
    %c0_157 = arith.constant 0 : index
    %c3 = arith.constant 3 : index
    %381 = vector.load %arg11[%c0_157, %c3] : memref<8x5xf32, #tpu.memory_space<vmem>>, vector<8x1xf32>
    tpu.vector_store %arg11[%c0_157, %c3], %380 {strides = array<i32>} : memref<8x5xf32, #tpu.memory_space<vmem>>, vector<8x1xf32>,
    %c56_158 = arith.constant 56 : index
    %c0_159 = arith.constant 0 : index
    %382 = vector.load %arg15[%c56_158, %c0_159] : memref<64x32xf32, #tpu.memory_space<vmem>>, vector<8x32xf32>
    %cst_160 = arith.constant dense<0.000000e+00> : vector<8x1xf32>
    %383 = tpu.matmul %382, %340, %cst_160 {dimension_numbers = #tpu.dot_dimension_numbers<[1], [0], [0], [1], [0, 0, 1, 1], [], []>} : vector<8x32xf32>, vector<32x1xf32>, vector<8x1xf32> -> vector<8x1xf32>
    %384 = vector.broadcast %341 : vector<1x1xf32> to vector<8x1xf32>
    %385 = arith.addf %383, %384 : vector<8x1xf32>
    %386 = arith.negf %385 : vector<8x1xf32>
    %387 = math.exp %386 : vector<8x1xf32>
    %cst_161 = arith.constant 1.000000e+00 : f32
    %388 = vector.broadcast %cst_161 : f32 to vector<8x1xf32>
    %389 = arith.addf %388, %387 : vector<8x1xf32>
    %390 = arith.divf %388, %389 : vector<8x1xf32>
    %c0_162 = arith.constant 0 : index
    %c4 = arith.constant 4 : index
    %391 = vector.load %arg11[%c0_162, %c4] : memref<8x5xf32, #tpu.memory_space<vmem>>, vector<8x1xf32>
    tpu.vector_store %arg11[%c0_162, %c4], %390 {strides = array<i32>} : memref<8x5xf32, #tpu.memory_space<vmem>>, vector<8x1xf32>,
    return
  }
}

</mosaic_0001>

<bundles_post_ra>
// kernel: sentiment_forward.1
= control target key start
LH: loop header
LB: loop body
LE: loop exit
PB: predicated region body
PF: predicated region fallthrough
CT: control target
= control target key end

     0   :  { %s3826_s0 = inlined_call_operand.vmem [shape: f32[64,16], index: 0, kind: input, shape index: {}]   ;;  %s3827_s1 = inlined_call_operand.vmem [shape: f32[2,8,32], index: 1, kind: input, shape index: {}]   ;;  %s3828_s2 = inlined_call_operand.vmem [shape: f32[2,8,32], index: 2, kind: input, shape index: {}]   ;;  %s3829_s3 = inlined_call_operand.vmem [shape: f32[16,128], index: 3, kind: input, shape index: {}]   ;;  %s3830_s4 = inlined_call_operand.vmem [shape: f32[32,128], index: 4, kind: input, shape index: {}]   ;;  %s3831_s5 = inlined_call_operand.vmem [shape: f32[1,128], index: 5, kind: input, shape index: {}]   ;;  %s3832_s6 = inlined_call_operand.vmem [shape: f32[32,128], index: 6, kind: input, shape index: {}]   ;;  %s3833_s7 = inlined_call_operand.vmem [shape: f32[32,128], index: 7, kind: input, shape index: {}]   ;;  %s3834_s8 = inlined_call_operand.vmem [shape: f32[1,128], index: 8, kind: input, shape index: {}]   ;;  %s3835_s9 = inlined_call_operand.vmem [shape: f32[32,1], index: 9, kind: input, shape index: {}]   ;;  %s3836_s10 = inlined_call_operand.<no memory space> [shape: f32[1,1], index: 10, kind: input, shape index: {}]   ;;  %s3837_s11 = inlined_call_operand.hbm [shape: f32[8,5], index: 11, kind: output, shape index: {0}]   ;;  %s3838_s12 = inlined_call_operand.hbm [shape: f32[2,8,32], index: 12, kind: output, shape index: {1}]   ;;  %s3839_s13 = inlined_call_operand.hbm [shape: f32[2,8,32], index: 13, kind: output, shape index: {2}]  }
   0x1   :  { %v19_v0 = vstv %s3836_s10 }
   0x2   :  { %20 = vst [vmem:[#allocation5] sm:$0x1] %v19_v0 }
   0x3   :  { %21 = vsyncpa [#allocation7], 0  ;;  %v54_v1 = vld [vmem:[%s3829_s3 + $0x8] sm:$0xff]  ;;  %v3301_v2 = vld [vmem:[%s3830_s4 + $0x18] sm:$0xff]  ;;  %v3208_v4 = vmov 0.0   ;;  %vm62_vm0 = vcmask 130048  }
   0x4   :  { %v53_v3 = vld [vmem:[%s3829_s3] sm:$0xff]  ;;  %2715 = vmatprep.subr.mxu0 %v54_v1  ;;  %2731 = vmatprep.subr.mxu1 %v3208_v4  ;;  %v3314_v6 = vld [vmem:[%s3830_s4 + $0x10] sm:$0xff]  ;;  %v46_v7 = vld [vmem:[%s3826_s0 + $0x8] sm:$0xff] }
   0x5   :  { %v45_v5 = vld [vmem:[%s3826_s0] sm:$0xff]  ;;  %2716 = vmatpush3.msra.mxu0 %v54_v1  ;;  %2732 = vmatpush3.msra.mxu1 %v3301_v2 }
   0x6   :  { %2717 = vmatprep.subr.mxu0 %v53_v3  ;;  %2733 = vmatprep.subr.mxu1 %v3208_v4 }
   0x7   :  { %22 = vsyncpa [#allocation9], 0  ;;  %2718 = vmatpush3.msra.mxu0 %v53_v3  ;;  %2719 = vmatprep.mubr.msk.f32.mxu0 %vm62_vm0, %v45_v5  ;;  %v3324_v8 = vld [vmem:[%s3830_s4 + $0x8] sm:$0xff]  ;;  %v3332_v9 = vld [vmem:[%s3830_s4] sm:$0xff]  ;;  %vm3209_vm1 = vmmov 0   ;;  %vm207_vm2 = vcmask 261120  }
   0x8   :  { %2734 = vmatpush3.msra.mxu1 %v3314_v6  ;;  %2720 = vmatmul.mubr.msk.f32.vlgmr.msra.gmra.mxu0 %vm62_vm0, %v46_v7  ;;  %v204_v10 = vld [vmem:[%s3827_s1] sm:$0xff]  ;;  %s3210_s27 = smov 64   ;;  %s3211_s30 = smov 32   ;;  %v47_v48 = vld [vmem:[%s3826_s0 + $0x10] sm:$0xff]  ;;  %v48_v49 = vld [vmem:[%s3826_s0 + $0x18] sm:$0xff]  ;;  %vm2134_vm3 = vcmask 7168  }
   0x9   :  { %2735 = vmatprep.subr.mxu1 %v3208_v4  ;;  %2739 = vmatprep.mubr.msk.f32.mxu1 %vm3209_vm1, %v3208_v4  ;;  %v3366_v12 = vld [vmem:[%s3831_s5] ss:$0 sm:$0xff]  ;;  %v50_v51 = vld [vmem:[%s3826_s0 + $0x28] sm:$0xff]  ;;  %v51_v52 = vld [vmem:[%s3826_s0 + $0x30] sm:$0xff]  ;;  %s3213_s26 = smov 3   ;;  %s3214_s28 = smov 96  }
   0xa   :  { %2736 = vmatpush3.msra.mxu1 %v3324_v8  ;;  %2753 = vmatprep.subr.mxu0 %v3208_v4  ;;  %v205_v19 = vld [vmem:[%s3828_s2] sm:$0xff]  ;;  %v52_v53 = vld [vmem:[%s3826_s0 + $0x38] sm:$0xff]  ;;  %vm2220_vm4 = vcmask 15368   ;;  %vm2306_vm5 = vcmask 23568   ;;  %vm2392_vm6 = vcmask 31768  }
   0xb   :  { %2737 = vmatprep.subr.mxu1 %v3208_v4  ;;  %2754 = vmatpush3.msra.mxu0 %v3301_v2  ;;  %v49_v50 = vld [vmem:[%s3826_s0 + $0x20] sm:$0xff] }
   0xc   :  { %2738 = vmatpush3.msra.mxu1 %v3332_v9  ;;  %2755 = vmatprep.subr.mxu0 %v3208_v4 }
   0xd   :  { %2740 = vmatmul.mubr.msk.f32.vlgmr.msra.gmra.mxu1 %vm207_vm2, %v204_v10  ;;  %2742 = vmatprep.subr.mxu1 %v3208_v4 }
   0xe   :  { %2743 = vmatpush3.msra.mxu1 %v3301_v2  ;;  %2750 = vmatprep.mubr.msk.f32.mxu1 %vm3209_vm1, %v3208_v4 }
   0xf   :  { %2744 = vmatprep.subr.mxu1 %v3208_v4  ;;  %2756 = vmatpush3.msra.mxu0 %v3314_v6 }
  0x10   :  { %2745 = vmatpush3.msra.mxu1 %v3314_v6  ;;  %2757 = vmatprep.subr.mxu0 %v3208_v4 }
  0x11   :  { %2746 = vmatprep.subr.mxu1 %v3208_v4  ;;  %2758 = vmatpush3.msra.mxu0 %v3324_v8 }
  0x12   :  { %2747 = vmatpush3.msra.mxu1 %v3324_v8  ;;  %2759 = vmatprep.subr.mxu0 %v3208_v4 }
  0x13   :  { %2748 = vmatprep.subr.mxu1 %v3208_v4  ;;  %2760 = vmatpush3.msra.mxu0 %v3332_v9 }
  0x14   :  { %2749 = vmatpush3.msra.mxu1 %v3332_v9  ;;  %2775 = vmatprep.subr.mxu0 %v3208_v4 }
  0x15   :  { %2764 = vmatprep.subr.mxu1 %v3208_v4  ;;  %2722 = vmatprep.mubr.msk.f32.mxu0 %vm62_vm0, %v47_v48 }
  0x16   :  { %2723 = vmatmul.mubr.msk.f32.gmra.mxu0 %vm62_vm0, %v48_v49 }
  0x17   :  { %2725 = vmatprep.mubr.msk.f32.mxu0 %vm62_vm0, %v49_v50 }
  0x1a   :  { %2726 = vmatmul.mubr.msk.f32.gmra.mxu0 %vm62_vm0, %v50_v51 }
  0x1b   :  { %2728 = vmatprep.mubr.msk.f32.mxu0 %vm62_vm0, %v51_v52 }
  0x1e   :  { %2729 = vmatmul.mubr.msk.f32.gmra.mxu0 %vm62_vm0, %v52_v53 }
  0x1f   :  { %2761 = vmatprep.mubr.msk.f32.mxu0 %vm3209_vm1, %v3208_v4 }
  0xc8   :  { %v2721_v11 = vpop.f32.mrf.mxu0 }
  0xc9   :  { %v159_v34 = vadd.f32 %v2721_v11, %v3366_v12 }
  0xca   :  { %v153_v13 = vpop.f32.mrf.mxu0 }
  0xcb   :  { %v154_v14 = vadd.f32 %v3366_v12, %v153_v13 }
  0xcd   :  { %v277_v15 = vpop.f32.mrf.mxu1 }
  0xce   :  { %v281_v16 = vadd.f32 %v277_v15, %v154_v14 }
  0xcf   :  { %v2741_v17 = vpop.f32.mrf.mxu1 }
  0xd0   :  { %2996 = vtanh.f32 %v281_v16  ;;  %v2535_v20 = vmul.f32 -1.442695, %v281_v16 }
  0xd2   :  { %2998 = vpow2.f32 %v2535_v20 }
  0xd6   :  { %v2724_v58 = vpop.f32.mrf.mxu0 }
  0xd8   :  { %v163_v59 = vpop.f32.mrf.mxu0 }
  0xd9   :  { %v164_v0 = vadd.f32 %v3366_v12, %v163_v59 }
  0xda   :  { %v3432_v60 = vpop.f32.mrf.mxu0 }
  0xdc   :  { %v3434_v61 = vpop.f32.mrf.mxu0 }
  0xdd   :  { %v2997_v18 = vpop.eup %2996 }
  0xde   :  { %295 = vrot.lane.b32.xlu0 %v2997_v18, %s3210_s27  ;;  %v3436_v62 = vpop.f32.mrf.mxu0 }
  0xdf   :  { %v2999_v21 = vpop.eup %2998 }
  0xe0   :  { %v285_v22 = vadd.f32 1.0, %v2999_v21  ;;  %v3438_v63 = vpop.f32.mrf.mxu0 }
  0xe2   :  { %290 = vrot.lane.b32.xlu0 %v205_v19, %s3211_s30  ;;  %3000 = vrcp.f32 %v285_v22 }
  0xef   :  { %v3001_v23 = vpop.eup %3000 }
 0x150   :  { %v296_v24 = vpop.permute.xlu0 %295 }
 0x151   :  { %v298_v25 = vmul.f32 %v3001_v23, %v296_v24  ;;  %v169_v24 = vadd.f32 %v2724_v58, %v3366_v12 }
 0x153   :  { %300 = vrot.lane.b32.xlu1 %v298_v25, %s3211_s30 }
 0x154   :  { %v291_v26 = vpop.permute.xlu0 %290 }
 0x155   :  { %v293_v27 = vmul.f32 %v3001_v23, %v291_v26 }
 0x1c5   :  { %v301_v28 = vpop.permute.xlu1 %300 }
 0x1c6   :  { %v303_v29 = vadd.f32 %v301_v28, %v293_v27 }
 0x1c8   :  { %3002 = vtanh.f32 %v303_v29 }
 0x1d5   :  { %v3003_v30 = vpop.eup %3002 }
 0x1d6   :  { %306 = vrot.lane.b32.xlu1 %v3003_v30, %s3210_s27 }
 0x248   :  { %v307_v31 = vpop.permute.xlu1 %306 }
 0x249   :  { %v309_v32 = vmul.f32 %v3001_v23, %v307_v31 }
 0x24b   :  { %311 = vrot.lane.b32.xlu0 %v309_v32, %s3211_s30 }
 0x2bd   :  { %v312_v33 = vpop.permute.xlu0 %311 }
 0x2be   :  { %314 = vst.msk [vmem:[#allocation3] sm:$0xff] %vm207_vm2, %v312_v33  ;;  %2751 = vmatmul.mubr.msk.f32.vlgmr.msra.gmra.mxu1 %vm207_vm2, %v312_v33 }
 0x2bf   :  { %2765 = vmatpush3.msra.mxu1 %v3301_v2  ;;  %2772 = vmatprep.mubr.msk.f32.mxu1 %vm3209_vm1, %v3208_v4 }
 0x2c0   :  { %2766 = vmatprep.subr.mxu1 %v3208_v4 }
 0x2c1   :  { %2767 = vmatpush3.msra.mxu1 %v3314_v6 }
 0x2c2   :  { %2768 = vmatprep.subr.mxu1 %v3208_v4 }
 0x2c3   :  { %2769 = vmatpush3.msra.mxu1 %v3324_v8 }
 0x2c4   :  { %2770 = vmatprep.subr.mxu1 %v3208_v4 }
 0x2c5   :  { %2771 = vmatpush3.msra.mxu1 %v3332_v9 }
 0x2c6   :  { %2786 = vmatprep.subr.mxu1 %v3208_v4 }
 0x37e   :  { %v384_v35 = vpop.f32.mrf.mxu1 }
 0x37f   :  { %v388_v36 = vadd.f32 %v384_v35, %v159_v34 }
 0x380   :  { %v2752_v37 = vpop.f32.mrf.mxu1 }
 0x381   :  { %3004 = vtanh.f32 %v388_v36  ;;  %v2537_v39 = vmul.f32 -1.442695, %v388_v36 }
 0x383   :  { %3006 = vpow2.f32 %v2537_v39 }
 0x38e   :  { %v3005_v38 = vpop.eup %3004 }
 0x38f   :  { %398 = vrot.lane.b32.xlu1 %v3005_v38, %s3210_s27 }
 0x390   :  { %v3007_v40 = vpop.eup %3006 }
 0x391   :  { %v392_v41 = vadd.f32 1.0, %v3007_v40 }
 0x393   :  { %3008 = vrcp.f32 %v392_v41 }
 0x3a0   :  { %v3009_v42 = vpop.eup %3008 }
 0x3a1   :  { %v396_v45 = vmul.f32 %v3009_v42, %v303_v29 }
 0x401   :  { %v399_v43 = vpop.permute.xlu1 %398 }
 0x402   :  { %v401_v44 = vmul.f32 %v3009_v42, %v399_v43 }
 0x404   :  { %403 = vrot.lane.b32.xlu0 %v401_v44, %s3211_s30 }
 0x476   :  { %v404_v46 = vpop.permute.xlu0 %403 }
 0x477   :  { %v406_v47 = vadd.f32 %v404_v46, %v396_v45 }
 0x479   :  { %3010 = vtanh.f32 %v406_v47 }
 0x486   :  { %v3011_v54 = vpop.eup %3010 }
 0x487   :  { %409 = vrot.lane.b32.xlu1 %v3011_v54, %s3210_s27 }
 0x4f9   :  { %v410_v55 = vpop.permute.xlu1 %409 }
 0x4fa   :  { %v412_v56 = vmul.f32 %v3009_v42, %v410_v55  ;;  %v174_v42 = vadd.f32 %v3366_v12, %v3434_v61 }
 0x4fc   :  { %414 = vrot.lane.b32.xlu0 %v412_v56, %s3211_s30 }
 0x56e   :  { %v415_v57 = vpop.permute.xlu0 %414 }
 0x56f   :  { %417 = vst.msk [vmem:[#allocation3 + $0x8] sm:$0xff] %vm207_vm2, %v415_v57  ;;  %2762 = vmatmul.mubr.msk.f32.vlgmr.msra.gmra.mxu0 %vm207_vm2, %v415_v57 }
 0x570   :  { %2776 = vmatpush3.msra.mxu0 %v3301_v2  ;;  %2783 = vmatprep.mubr.msk.f32.mxu0 %vm3209_vm1, %v3208_v4 }
 0x571   :  { %2777 = vmatprep.subr.mxu0 %v3208_v4 }
 0x572   :  { %2778 = vmatpush3.msra.mxu0 %v3314_v6 }
 0x573   :  { %2779 = vmatprep.subr.mxu0 %v3208_v4 }
 0x574   :  { %2780 = vmatpush3.msra.mxu0 %v3324_v8 }
 0x575   :  { %2781 = vmatprep.subr.mxu0 %v3208_v4 }
 0x576   :  { %2782 = vmatpush3.msra.mxu0 %v3332_v9 }
 0x577   :  { %2797 = vmatprep.subr.mxu0 %v3208_v4 }
 0x62f   :  { %v487_v1 = vpop.f32.mrf.mxu0 }
 0x630   :  { %v491_v3 = vadd.f32 %v487_v1, %v164_v0 }
 0x631   :  { %v2763_v5 = vpop.f32.mrf.mxu0 }
 0x632   :  { %3012 = vtanh.f32 %v491_v3  ;;  %v2539_v10 = vmul.f32 -1.442695, %v491_v3 }
 0x634   :  { %3014 = vpow2.f32 %v2539_v10 }
 0x63f   :  { %v3013_v7 = vpop.eup %3012 }
 0x640   :  { %501 = vrot.lane.b32.xlu1 %v3013_v7, %s3210_s27 }
 0x641   :  { %v3015_v11 = vpop.eup %3014 }
 0x642   :  { %v495_v13 = vadd.f32 1.0, %v3015_v11 }
 0x644   :  { %3016 = vrcp.f32 %v495_v13 }
 0x651   :  { %v3017_v14 = vpop.eup %3016 }
 0x652   :  { %v499_v17 = vmul.f32 %v3017_v14, %v406_v47 }
 0x6b2   :  { %v502_v15 = vpop.permute.xlu1 %501 }
 0x6b3   :  { %v504_v16 = vmul.f32 %v3017_v14, %v502_v15 }
 0x6b5   :  { %506 = vrot.lane.b32.xlu0 %v504_v16, %s3211_s30 }
 0x727   :  { %v507_v18 = vpop.permute.xlu0 %506 }
 0x728   :  { %v509_v19 = vadd.f32 %v507_v18, %v499_v17 }
 0x72a   :  { %3018 = vtanh.f32 %v509_v19 }
 0x737   :  { %v3019_v20 = vpop.eup %3018 }
 0x738   :  { %512 = vrot.lane.b32.xlu1 %v3019_v20, %s3210_s27  ;;  %v1042_v20 = vld [vmem:[#allocation3] sm:$0xff] }
 0x7aa   :  { %v513_v21 = vpop.permute.xlu1 %512 }
 0x7ab   :  { %v515_v22 = vmul.f32 %v3017_v14, %v513_v21  ;;  %v1053_v14 = vld [vmem:[%s3832_s6 + $0x18] sm:$0xff]  ;;  %v1051_v21 = vld [vmem:[%s3832_s6 + $0x8] sm:$0xff] }
 0x7ad   :  { %517 = vrot.lane.b32.xlu0 %v515_v22, %s3211_s30  ;;  %v1050_v22 = vld [vmem:[%s3832_s6] sm:$0xff] }
 0x81f   :  { %v518_v23 = vpop.permute.xlu0 %517 }
 0x820   :  { %520 = vst.msk [vmem:[#allocation3 + $0x10] sm:$0xff] %vm207_vm2, %v518_v23  ;;  %2773 = vmatmul.mubr.msk.f32.vlgmr.msra.gmra.mxu1 %vm207_vm2, %v518_v23  ;;  %v1043_v23 = vld [vmem:[#allocation3 + $0x8] sm:$0xff] }
 0x821   :  { %2787 = vmatpush3.msra.mxu1 %v3301_v2  ;;  %2794 = vmatprep.mubr.msk.f32.mxu1 %vm3209_vm1, %v3208_v4 }
 0x822   :  { %2788 = vmatprep.subr.mxu1 %v3208_v4 }
 0x823   :  { %2789 = vmatpush3.msra.mxu1 %v3314_v6 }
 0x824   :  { %2790 = vmatprep.subr.mxu1 %v3208_v4 }
 0x825   :  { %2791 = vmatpush3.msra.mxu1 %v3324_v8 }
 0x826   :  { %2792 = vmatprep.subr.mxu1 %v3208_v4 }
 0x827   :  { %2793 = vmatpush3.msra.mxu1 %v3332_v9 }
 0x828   :  { %2808 = vmatprep.subr.mxu1 %v3208_v4 }
 0x8e0   :  { %v590_v25 = vpop.f32.mrf.mxu1 }
 0x8e1   :  { %v594_v26 = vadd.f32 %v590_v25, %v169_v24  ;;  %v1044_v24 = vld [vmem:[#allocation3 + $0x10] sm:$0xff] }
 0x8e2   :  { %v2774_v27 = vpop.f32.mrf.mxu1 }
 0x8e3   :  { %3020 = vtanh.f32 %v594_v26  ;;  %v2541_v29 = vmul.f32 -1.442695, %v594_v26 }
 0x8e5   :  { %3022 = vpow2.f32 %v2541_v29 }
 0x8f0   :  { %v3021_v28 = vpop.eup %3020 }
 0x8f1   :  { %604 = vrot.lane.b32.xlu1 %v3021_v28, %s3210_s27  ;;  %v184_v28 = vadd.f32 %v3366_v12, %v3438_v63 }
 0x8f2   :  { %v3023_v30 = vpop.eup %3022 }
 0x8f3   :  { %v598_v31 = vadd.f32 1.0, %v3023_v30 }
 0x8f5   :  { %3024 = vrcp.f32 %v598_v31 }
 0x902   :  { %v3025_v32 = vpop.eup %3024 }
 0x903   :  { %v602_v35 = vmul.f32 %v3025_v32, %v509_v19  ;;  %v1052_v19 = vld [vmem:[%s3832_s6 + $0x10] sm:$0xff] }
 0x963   :  { %v605_v33 = vpop.permute.xlu1 %604 }
 0x964   :  { %v607_v34 = vmul.f32 %v3025_v32, %v605_v33 }
 0x966   :  { %609 = vrot.lane.b32.xlu0 %v607_v34, %s3211_s30 }
 0x9d8   :  { %v610_v36 = vpop.permute.xlu0 %609 }
 0x9d9   :  { %v612_v37 = vadd.f32 %v610_v36, %v602_v35 }
 0x9db   :  { %3026 = vtanh.f32 %v612_v37 }
 0x9e8   :  { %v3027_v38 = vpop.eup %3026 }
 0x9e9   :  { %615 = vrot.lane.b32.xlu1 %v3027_v38, %s3210_s27 }
 0xa5b   :  { %v616_v39 = vpop.permute.xlu1 %615 }
 0xa5c   :  { %v618_v40 = vmul.f32 %v3025_v32, %v616_v39 }
 0xa5e   :  { %620 = vrot.lane.b32.xlu0 %v618_v40, %s3211_s30 }
 0xad0   :  { %v621_v41 = vpop.permute.xlu0 %620 }
 0xad1   :  { %623 = vst.msk [vmem:[#allocation3 + $0x18] sm:$0xff] %vm207_vm2, %v621_v41  ;;  %2784 = vmatmul.mubr.msk.f32.vlgmr.msra.gmra.mxu0 %vm207_vm2, %v621_v41 }
 0xad2   :  { %2798 = vmatpush3.msra.mxu0 %v3301_v2  ;;  %2805 = vmatprep.mubr.msk.f32.mxu0 %vm3209_vm1, %v3208_v4 }
 0xad3   :  { %2799 = vmatprep.subr.mxu0 %v3208_v4 }
 0xad4   :  { %2800 = vmatpush3.msra.mxu0 %v3314_v6 }
 0xad5   :  { %2801 = vmatprep.subr.mxu0 %v3208_v4 }
 0xad6   :  { %2802 = vmatpush3.msra.mxu0 %v3324_v8 }
 0xad7   :  { %2803 = vmatprep.subr.mxu0 %v3208_v4 }
 0xad8   :  { %2804 = vmatpush3.msra.mxu0 %v3332_v9  ;;  %v1045_v25 = vld [vmem:[#allocation3 + $0x18] sm:$0xff] }
 0xad9   :  { %2819 = vmatprep.subr.mxu0 %v1053_v14 }
 0xb91   :  { %v693_v43 = vpop.f32.mrf.mxu0 }
 0xb92   :  { %v697_v44 = vadd.f32 %v693_v43, %v174_v42  ;;  %v3529_v42 = vld [vmem:[%s3833_s7 + $0x18] sm:$0xff]  ;;  %v3535_v43 = vld [vmem:[%s3833_s7 + $0x10] sm:$0xff] }
 0xb93   :  { %v2785_v45 = vpop.f32.mrf.mxu0 }
 0xb94   :  { %3028 = vtanh.f32 %v697_v44  ;;  %v2543_v47 = vmul.f32 -1.442695, %v697_v44  ;;  %v3542_v44 = vld [vmem:[%s3833_s7 + $0x8] sm:$0xff]  ;;  %v3549_v45 = vld [vmem:[%s3833_s7] sm:$0xff] }
 0xb96   :  { %3030 = vpow2.f32 %v2543_v47 }
 0xba1   :  { %v3029_v46 = vpop.eup %3028 }
 0xba2   :  { %707 = vrot.lane.b32.xlu1 %v3029_v46, %s3210_s27 }
 0xba3   :  { %v3031_v48 = vpop.eup %3030 }
 0xba4   :  { %v701_v49 = vadd.f32 1.0, %v3031_v48  ;;  %v2560_v48 = vld [vmem:[%s3828_s2 + $0x8] sm:$0xff] }
 0xba6   :  { %3032 = vrcp.f32 %v701_v49 }
 0xbb3   :  { %v3033_v50 = vpop.eup %3032 }
 0xbb4   :  { %v705_v53 = vmul.f32 %v3033_v50, %v612_v37 }
 0xc14   :  { %v708_v51 = vpop.permute.xlu1 %707 }
 0xc15   :  { %v710_v52 = vmul.f32 %v3033_v50, %v708_v51 }
 0xc17   :  { %712 = vrot.lane.b32.xlu0 %v710_v52, %s3211_s30  ;;  %v189_v52 = vadd.f32 %v3436_v62, %v3366_v12 }
 0xc89   :  { %v713_v54 = vpop.permute.xlu0 %712 }
 0xc8a   :  { %v715_v55 = vadd.f32 %v713_v54, %v705_v53 }
 0xc8c   :  { %3034 = vtanh.f32 %v715_v55 }
 0xc99   :  { %v3035_v56 = vpop.eup %3034 }
 0xc9a   :  { %718 = vrot.lane.b32.xlu1 %v3035_v56, %s3210_s27 }
 0xd0c   :  { %v719_v57 = vpop.permute.xlu1 %718 }
 0xd0d   :  { %v721_v58 = vmul.f32 %v3033_v50, %v719_v57  ;;  %v2559_v50 = vld [vmem:[%s3827_s1 + $0x8] sm:$0xff] }
 0xd0f   :  { %723 = vrot.lane.b32.xlu0 %v721_v58, %s3211_s30  ;;  %v3593_v58 = vld [vmem:[%s3834_s8] ss:$0 sm:$0xff] }
 0xd81   :  { %v724_v59 = vpop.permute.xlu0 %723 }
 0xd82   :  { %726 = vst.msk [vmem:[#allocation3 + $0x20] sm:$0xff] %vm207_vm2, %v724_v59  ;;  %2795 = vmatmul.mubr.msk.f32.vlgmr.msra.gmra.mxu1 %vm207_vm2, %v724_v59 }
 0xd83   :  { %2809 = vmatpush3.msra.mxu1 %v3301_v2  ;;  %2816 = vmatprep.mubr.msk.f32.mxu1 %vm3209_vm1, %v3208_v4  ;;  %v179_v2 = vadd.f32 %v3432_v60, %v3366_v12 }
 0xd84   :  { %2810 = vmatprep.subr.mxu1 %v3208_v4 }
 0xd85   :  { %2811 = vmatpush3.msra.mxu1 %v3314_v6 }
 0xd86   :  { %2812 = vmatprep.subr.mxu1 %v3208_v4 }
 0xd87   :  { %2813 = vmatpush3.msra.mxu1 %v3324_v8 }
 0xd88   :  { %2814 = vmatprep.subr.mxu1 %v3208_v4 }
 0xd89   :  { %2815 = vmatpush3.msra.mxu1 %v3332_v9  ;;  %v1046_v26 = vld [vmem:[#allocation3 + $0x20] sm:$0xff] }
 0xd8a   :  { %2839 = vmatprep.subr.mxu1 %v3208_v4 }
 0xe42   :  { %v796_v61 = vpop.f32.mrf.mxu1 }
 0xe43   :  { %v800_v0 = vadd.f32 %v796_v61, %v179_v2 }
 0xe44   :  { %v2796_v1 = vpop.f32.mrf.mxu1 }
 0xe45   :  { %3036 = vtanh.f32 %v800_v0  ;;  %v2545_v6 = vmul.f32 -1.442695, %v800_v0 }
 0xe47   :  { %3038 = vpow2.f32 %v2545_v6 }
 0xe52   :  { %v3037_v3 = vpop.eup %3036 }
 0xe53   :  { %810 = vrot.lane.b32.xlu1 %v3037_v3, %s3210_s27 }
 0xe54   :  { %v3039_v5 = vpop.eup %3038 }
 0xe55   :  { %v804_v8 = vadd.f32 1.0, %v3039_v5 }
 0xe57   :  { %3040 = vrcp.f32 %v804_v8 }
 0xe64   :  { %v3041_v7 = vpop.eup %3040 }
 0xe65   :  { %v808_v11 = vmul.f32 %v3041_v7, %v715_v55 }
 0xec5   :  { %v811_v10 = vpop.permute.xlu1 %810 }
 0xec6   :  { %v813_v9 = vmul.f32 %v3041_v7, %v811_v10 }
 0xec8   :  { %815 = vrot.lane.b32.xlu0 %v813_v9, %s3211_s30 }
 0xf3a   :  { %v816_v13 = vpop.permute.xlu0 %815 }
 0xf3b   :  { %v818_v60 = vadd.f32 %v816_v13, %v808_v11 }
 0xf3d   :  { %3042 = vtanh.f32 %v818_v60 }
 0xf4a   :  { %v3043_v15 = vpop.eup %3042 }
 0xf4b   :  { %821 = vrot.lane.b32.xlu1 %v3043_v15, %s3210_s27 }
 0xfbd   :  { %v822_v16 = vpop.permute.xlu1 %821 }
 0xfbe   :  { %v824_v17 = vmul.f32 %v3041_v7, %v822_v16 }
 0xfc0   :  { %826 = vrot.lane.b32.xlu0 %v824_v17, %s3211_s30 }
0x1032   :  { %v827_v18 = vpop.permute.xlu0 %826 }
0x1033   :  { %829 = vst.msk [vmem:[#allocation3 + $0x28] sm:$0xff] %vm207_vm2, %v827_v18  ;;  %2806 = vmatmul.mubr.msk.f32.vlgmr.msra.gmra.mxu0 %vm207_vm2, %v827_v18 }
0x1034   :  { %2820 = vmatpush3.msra.mxu0 %v1053_v14  ;;  %2827 = vmatprep.mubr.msk.f32.mxu0 %vm207_vm2, %v1042_v20 }
0x1035   :  { %2821 = vmatprep.subr.mxu0 %v1052_v19 }
0x1036   :  { %2822 = vmatpush3.msra.mxu0 %v1052_v19 }
0x1037   :  { %2823 = vmatprep.subr.mxu0 %v1051_v21 }
0x1038   :  { %2824 = vmatpush3.msra.mxu0 %v1051_v21 }
0x1039   :  { %2825 = vmatprep.subr.mxu0 %v1050_v22 }
0x103a   :  { %2826 = vmatpush3.msra.mxu0 %v1050_v22  ;;  %v1047_v27 = vld [vmem:[#allocation3 + $0x28] sm:$0xff] }
0x103b   :  { %2828 = vmatmul.mubr.msk.f32.vlgmr.msra.gmra.mxu0 %vm207_vm2, %v1043_v23  ;;  %2861 = vmatprep.subr.mxu0 %v3208_v4 }
0x103c   :  { %2830 = vmatprep.mubr.msk.f32.mxu0 %vm207_vm2, %v1044_v24  ;;  %2862 = vmatpush3.msra.mxu0 %v3529_v42 }
0x103d   :  { %2863 = vmatprep.subr.mxu0 %v3208_v4 }
0x103e   :  { %2864 = vmatpush3.msra.mxu0 %v3535_v43 }
0x103f   :  { %2831 = vmatmul.mubr.msk.f32.gmra.mxu0 %vm207_vm2, %v1045_v25  ;;  %2865 = vmatprep.subr.mxu0 %v3208_v4 }
0x1040   :  { %2833 = vmatprep.mubr.msk.f32.mxu0 %vm207_vm2, %v1046_v26  ;;  %2866 = vmatpush3.msra.mxu0 %v3542_v44 }
0x1041   :  { %2867 = vmatprep.subr.mxu0 %v3208_v4 }
0x1042   :  { %2868 = vmatpush3.msra.mxu0 %v3549_v45 }
0x1043   :  { %2834 = vmatmul.mubr.msk.f32.gmra.mxu0 %vm207_vm2, %v1047_v27  ;;  %2883 = vmatprep.subr.mxu0 %v3208_v4 }
0x10f3   :  { %v899_v29 = vpop.f32.mrf.mxu0 }
0x10f4   :  { %v903_v30 = vadd.f32 %v899_v29, %v184_v28 }
0x10f5   :  { %v2807_v31 = vpop.f32.mrf.mxu0 }
0x10f6   :  { %3044 = vtanh.f32 %v903_v30  ;;  %v2547_v33 = vmul.f32 -1.442695, %v903_v30 }
0x10f8   :  { %3046 = vpow2.f32 %v2547_v33 }
0x10fb   :  { %v3588_v53 = vpop.f32.mrf.mxu0 }
0x10fc   :  { %v1157_v29 = vadd.f32 %v3588_v53, %v3593_v58 }
0x10fd   :  { %v1151_v57 = vpop.f32.mrf.mxu0 }
0x10fe   :  { %v1152_v59 = vadd.f32 %v3593_v58, %v1151_v57 }
0x1103   :  { %v3045_v32 = vpop.eup %3044 }
0x1104   :  { %913 = vrot.lane.b32.xlu1 %v3045_v32, %s3210_s27 }
0x1105   :  { %v3047_v34 = vpop.eup %3046 }
0x1106   :  { %v907_v35 = vadd.f32 1.0, %v3047_v34 }
0x1108   :  { %3048 = vrcp.f32 %v907_v35 }
0x1115   :  { %v3049_v36 = vpop.eup %3048 }
0x1116   :  { %v911_v39 = vmul.f32 %v3049_v36, %v818_v60 }
0x1176   :  { %v914_v37 = vpop.permute.xlu1 %913 }
0x1177   :  { %v916_v38 = vmul.f32 %v3049_v36, %v914_v37 }
0x1179   :  { %918 = vrot.lane.b32.xlu0 %v916_v38, %s3211_s30 }
0x11eb   :  { %v919_v40 = vpop.permute.xlu0 %918 }
0x11ec   :  { %v3522_v63 = vadd.f32 %v919_v40, %v911_v39 }
0x11ee   :  { %3050 = vtanh.f32 %v3522_v63 }
0x11fb   :  { %v3051_v41 = vpop.eup %3050 }
0x11fc   :  { %924 = vrot.lane.b32.xlu1 %v3051_v41, %s3210_s27 }
0x126e   :  { %v925_v46 = vpop.permute.xlu1 %924 }
0x126f   :  { %v927_v47 = vmul.f32 %v3049_v36, %v925_v46 }
0x1271   :  { %929 = vrot.lane.b32.xlu0 %v927_v47, %s3211_s30 }
0x1275   :  { %1289 = vrot.lane.b32.xlu0 %v2560_v48, %s3211_s30 }
0x12e3   :  { %v930_v49 = vpop.permute.xlu0 %929 }
0x12e4   :  { %932 = vst.msk [vmem:[#allocation3 + $0x30] sm:$0xff] %vm207_vm2, %v930_v49  ;;  %2817 = vmatmul.mubr.msk.f32.vlgmr.msra.gmra.mxu1 %vm207_vm2, %v930_v49 }
0x12e5   :  { %2840 = vmatpush3.msra.mxu1 %v3529_v42  ;;  %2847 = vmatprep.mubr.msk.f32.mxu1 %vm3209_vm1, %v3208_v4 }
0x12e6   :  { %2841 = vmatprep.subr.mxu1 %v3208_v4 }
0x12e7   :  { %2842 = vmatpush3.msra.mxu1 %v3535_v43  ;;  %v1290_v7 = vpop.permute.xlu0 %1289 }
0x12e8   :  { %2843 = vmatprep.subr.mxu1 %v3208_v4 }
0x12e9   :  { %2844 = vmatpush3.msra.mxu1 %v3542_v44 }
0x12ea   :  { %2845 = vmatprep.subr.mxu1 %v3208_v4 }
0x12eb   :  { %2846 = vmatpush3.msra.mxu1 %v3549_v45  ;;  %v1048_v51 = vld [vmem:[#allocation3 + $0x30] sm:$0xff] }
0x12ec   :  { %2848 = vmatmul.mubr.msk.f32.vlgmr.msra.gmra.mxu1 %vm207_vm2, %v2559_v50  ;;  %2836 = vmatprep.mubr.msk.f32.mxu0 %vm207_vm2, %v1048_v51 }
0x12ed   :  { %2850 = vmatprep.subr.mxu1 %v3208_v4  ;;  %2858 = vmatprep.mubr.msk.f32.mxu1 %vm3209_vm1, %v3208_v4 }
0x12ee   :  { %2851 = vmatpush3.msra.mxu1 %v3529_v42 }
0x12ef   :  { %2852 = vmatprep.subr.mxu1 %v3208_v4 }
0x12f0   :  { %2853 = vmatpush3.msra.mxu1 %v3535_v43 }
0x12f1   :  { %2854 = vmatprep.subr.mxu1 %v3208_v4 }
0x12f2   :  { %2855 = vmatpush3.msra.mxu1 %v3542_v44 }
0x12f3   :  { %2856 = vmatprep.subr.mxu1 %v3208_v4 }
0x12f4   :  { %2857 = vmatpush3.msra.mxu1 %v3549_v45 }
0x12f5   :  { %2872 = vmatprep.subr.mxu1 %v3208_v4 }
0x13a4   :  { %v1002_v54 = vpop.f32.mrf.mxu1 }
0x13a5   :  { %v1006_v55 = vadd.f32 %v1002_v54, %v189_v52  ;;  %v2832_v52 = vpop.f32.mrf.mxu0 }
0x13a6   :  { %v2818_v56 = vpop.f32.mrf.mxu1 }
0x13a7   :  { %v2549_v14 = vmul.f32 -1.442695, %v1006_v55  ;;  %v1161_v53 = vpop.f32.mrf.mxu0 }
0x13a9   :  { %v3643_v54 = vpop.f32.mrf.mxu0 }
0x13ac   :  { %v1276_v2 = vpop.f32.mrf.mxu1 }
0x13ad   :  { %v1280_v61 = vadd.f32 %v1276_v2, %v1152_v59  ;;  %v1162_v59 = vadd.f32 %v3593_v58, %v1161_v53 }
0x13ae   :  { %v2849_v0 = vpop.f32.mrf.mxu1 }
0x13af   :  { %3052 = vtanh.f32 %v1280_v61  ;;  %v2562_v12 = vmul.f32 -1.442695, %v1280_v61 }
0x13b1   :  { %3054 = vpow2.f32 %v2562_v12 }
0x13bc   :  { %v3053_v1 = vpop.eup %3052 }
0x13bd   :  { %1294 = vrot.lane.b32.xlu1 %v3053_v1, %s3210_s27 }
0x13be   :  { %v3055_v62 = vpop.eup %3054 }
0x13bf   :  { %v1284_v3 = vadd.f32 1.0, %v3055_v62 }
0x13c1   :  { %3056 = vrcp.f32 %v1284_v3 }
0x13ce   :  { %v3057_v6 = vpop.eup %3056 }
0x13cf   :  { %v1292_v10 = vmul.f32 %v3057_v6, %v1290_v7 }
0x142f   :  { %v1295_v5 = vpop.permute.xlu1 %1294 }
0x1430   :  { %v1297_v8 = vmul.f32 %v3057_v6, %v1295_v5 }
0x1432   :  { %1299 = vrot.lane.b32.xlu1 %v1297_v8, %s3211_s30 }
0x14a4   :  { %v1300_v9 = vpop.permute.xlu1 %1299 }
0x14a5   :  { %v1302_v11 = vadd.f32 %v1300_v9, %v1292_v10 }
0x14a7   :  { %3058 = vtanh.f32 %v1302_v11 }
0x14a8   :  { %3060 = vtanh.f32 %v1006_v55  ;;  %v3645_v55 = vpop.f32.mrf.mxu0 }
0x14a9   :  { %3062 = vpow2.f32 %v2549_v14 }
0x14b4   :  { %v3059_v13 = vpop.eup %3058 }
0x14b5   :  { %1305 = vrot.lane.b32.xlu0 %v3059_v13, %s3210_s27  ;;  %v3061_v60 = vpop.eup %3060 }
0x14b6   :  { %v3063_v15 = vpop.eup %3062 }
0x14b7   :  { %v1010_v16 = vadd.f32 1.0, %v3063_v15  ;;  %v1167_v15 = vadd.f32 %v2832_v52, %v3593_v58 }
0x14b9   :  { %1016 = vrot.lane.b32.xlu0 %v3061_v60, %s3210_s27  ;;  %3064 = vrcp.f32 %v1010_v16 }
0x14c6   :  { %v3065_v19 = vpop.eup %3064 }
0x14c7   :  { %v1014_v23 = vmul.f32 %v3065_v19, %v3522_v63 }
0x1527   :  { %v1306_v17 = vpop.permute.xlu0 %1305 }
0x1528   :  { %v1308_v18 = vmul.f32 %v3057_v6, %v1306_v17 }
0x152a   :  { %1310 = vrot.lane.b32.xlu1 %v1308_v18, %s3211_s30 }
0x152b   :  { %v1017_v20 = vpop.permute.xlu0 %1016 }
0x152c   :  { %v1019_v21 = vmul.f32 %v3065_v19, %v1017_v20 }
0x152e   :  { %1021 = vrot.lane.b32.xlu0 %v1019_v21, %s3211_s30 }
0x159c   :  { %v1311_v22 = vpop.permute.xlu1 %1310 }
0x159d   :  { %1313 = vst.msk [vmem:[#allocation3] sm:$0xff] %vm207_vm2, %v1311_v22  ;;  %2859 = vmatmul.mubr.msk.f32.vlgmr.msra.gmra.mxu1 %vm207_vm2, %v1311_v22 }
0x159e   :  { %2873 = vmatpush3.msra.mxu1 %v3529_v42  ;;  %2880 = vmatprep.mubr.msk.f32.mxu1 %vm3209_vm1, %v3208_v4 }
0x159f   :  { %2874 = vmatprep.subr.mxu1 %v3208_v4 }
0x15a0   :  { %v1022_v24 = vpop.permute.xlu0 %1021  ;;  %2875 = vmatpush3.msra.mxu1 %v3535_v43 }
0x15a1   :  { %v3610_v25 = vadd.f32 %v1022_v24, %v1014_v23  ;;  %2876 = vmatprep.subr.mxu1 %v3208_v4 }
0x15a2   :  { %2877 = vmatpush3.msra.mxu1 %v3542_v44 }
0x15a3   :  { %3066 = vtanh.f32 %v3610_v25  ;;  %2878 = vmatprep.subr.mxu1 %v3208_v4 }
0x15a4   :  { %2879 = vmatpush3.msra.mxu1 %v3549_v45 }
0x15a5   :  { %2894 = vmatprep.subr.mxu1 %v3208_v4 }
0x15b0   :  { %v3067_v26 = vpop.eup %3066 }
0x15b1   :  { %1027 = vrot.lane.b32.xlu0 %v3067_v26, %s3210_s27 }
0x1623   :  { %v1028_v27 = vpop.permute.xlu0 %1027 }
0x1624   :  { %v1030_v28 = vmul.f32 %v3065_v19, %v1028_v27 }
0x1626   :  { %1032 = vrot.lane.b32.xlu0 %v1030_v28, %s3211_s30 }
0x165d   :  { %v1383_v30 = vpop.f32.mrf.mxu1 }
0x165e   :  { %v1387_v31 = vadd.f32 %v1383_v30, %v1157_v29 }
0x165f   :  { %v2860_v32 = vpop.f32.mrf.mxu1 }
0x1660   :  { %3068 = vtanh.f32 %v1387_v31  ;;  %v2564_v36 = vmul.f32 -1.442695, %v1387_v31 }
0x1662   :  { %3070 = vpow2.f32 %v2564_v36 }
0x166d   :  { %v3069_v33 = vpop.eup %3068 }
0x166e   :  { %1397 = vrot.lane.b32.xlu1 %v3069_v33, %s3210_s27 }
0x166f   :  { %v3071_v37 = vpop.eup %3070 }
0x1670   :  { %v1391_v38 = vadd.f32 1.0, %v3071_v37 }
0x1672   :  { %3072 = vrcp.f32 %v1391_v38 }
0x167f   :  { %v3073_v39 = vpop.eup %3072 }
0x1680   :  { %v1395_v41 = vmul.f32 %v3073_v39, %v1302_v11 }
0x1698   :  { %v1033_v34 = vpop.permute.xlu0 %1032 }
0x1699   :  { %1035 = vst.msk [vmem:[#allocation3 + $0x38] sm:$0xff] %vm207_vm2, %v1033_v34  ;;  %1036 = vst.msk [vmem:[#allocation8] sm:$0xff] %vm207_vm2, %v1033_v34  ;;  %v1172_v34 = vadd.f32 %v3593_v58, %v3645_v55 }
0x16a0   :  { %v1049_v35 = vld [vmem:[#allocation3 + $0x38] sm:$0xff] }
0x16a1   :  { %2837 = vmatmul.mubr.msk.f32.gmra.mxu0 %vm207_vm2, %v1049_v35 }
0x16a2   :  { %2869 = vmatprep.mubr.msk.f32.mxu0 %vm3209_vm1, %v3208_v4 }
0x16e0   :  { %v1398_v40 = vpop.permute.xlu1 %1397 }
0x16e1   :  { %v1400_v63 = vmul.f32 %v3073_v39, %v1398_v40 }
0x16e3   :  { %1402 = vrot.lane.b32.xlu1 %v1400_v63, %s3211_s30 }
0x1755   :  { %v1403_v46 = vpop.permute.xlu1 %1402 }
0x1756   :  { %v1405_v47 = vadd.f32 %v1403_v46, %v1395_v41 }
0x1758   :  { %3074 = vtanh.f32 %v1405_v47 }
0x1761   :  { %v3647_v56 = vpop.f32.mrf.mxu0 }
0x1763   :  { %v3649_v57 = vpop.f32.mrf.mxu0 }
0x1765   :  { %v3075_v48 = vpop.eup %3074 }
0x1766   :  { %1408 = vrot.lane.b32.xlu1 %v3075_v48, %s3210_s27 }
0x17d8   :  { %v1409_v49 = vpop.permute.xlu1 %1408 }
0x17d9   :  { %v1411_v50 = vmul.f32 %v3073_v39, %v1409_v49 }
0x17db   :  { %1413 = vrot.lane.b32.xlu1 %v1411_v50, %s3211_s30 }
0x184d   :  { %v1414_v51 = vpop.permute.xlu1 %1413 }
0x184e   :  { %1416 = vst.msk [vmem:[#allocation3 + $0x8] sm:$0xff] %vm207_vm2, %v1414_v51  ;;  %2870 = vmatmul.mubr.msk.f32.vlgmr.msra.gmra.mxu0 %vm207_vm2, %v1414_v51 }
0x184f   :  { %2884 = vmatpush3.msra.mxu0 %v3529_v42  ;;  %2891 = vmatprep.mubr.msk.f32.mxu0 %vm3209_vm1, %v3208_v4 }
0x1850   :  { %2885 = vmatprep.subr.mxu0 %v3208_v4 }
0x1851   :  { %2886 = vmatpush3.msra.mxu0 %v3535_v43 }
0x1852   :  { %2887 = vmatprep.subr.mxu0 %v3208_v4 }
0x1853   :  { %2888 = vmatpush3.msra.mxu0 %v3542_v44 }
0x1854   :  { %2889 = vmatprep.subr.mxu0 %v3208_v4 }
0x1855   :  { %2890 = vmatpush3.msra.mxu0 %v3549_v45 }
0x1856   :  { %2905 = vmatprep.subr.mxu0 %v3208_v4 }
0x190e   :  { %v1486_v2 = vpop.f32.mrf.mxu0 }
0x190f   :  { %v1490_v61 = vadd.f32 %v1486_v2, %v1162_v59 }
0x1910   :  { %v2871_v0 = vpop.f32.mrf.mxu0 }
0x1911   :  { %3076 = vtanh.f32 %v1490_v61  ;;  %v2566_v12 = vmul.f32 -1.442695, %v1490_v61 }
0x1913   :  { %3078 = vpow2.f32 %v2566_v12 }
0x191e   :  { %v3077_v1 = vpop.eup %3076 }
0x191f   :  { %1500 = vrot.lane.b32.xlu0 %v3077_v1, %s3210_s27 }
0x1920   :  { %v3079_v62 = vpop.eup %3078 }
0x1921   :  { %v1494_v3 = vadd.f32 1.0, %v3079_v62 }
0x1923   :  { %3080 = vrcp.f32 %v1494_v3 }
0x1930   :  { %v3081_v6 = vpop.eup %3080 }
0x1931   :  { %v1498_v7 = vmul.f32 %v3081_v6, %v1405_v47 }
0x1991   :  { %v1501_v5 = vpop.permute.xlu0 %1500 }
0x1992   :  { %v1503_v8 = vmul.f32 %v3081_v6, %v1501_v5 }
0x1994   :  { %1505 = vrot.lane.b32.xlu1 %v1503_v8, %s3211_s30 }
0x1a06   :  { %v1506_v10 = vpop.permute.xlu1 %1505 }
0x1a07   :  { %v1508_v9 = vadd.f32 %v1506_v10, %v1498_v7  ;;  %v3715_v10 = vld [vmem:[%s3835_s9 + $0x18] sm:$0xff] }
0x1a09   :  { %3082 = vtanh.f32 %v1508_v9 }
0x1a16   :  { %v3083_v11 = vpop.eup %3082 }
0x1a17   :  { %1511 = vrot.lane.b32.xlu0 %v3083_v11, %s3210_s27  ;;  %v3722_v11 = vld [vmem:[%s3835_s9 + $0x10] sm:$0xff] }
0x1a89   :  { %v1512_v13 = vpop.permute.xlu0 %1511 }
0x1a8a   :  { %v1514_v60 = vmul.f32 %v3081_v6, %v1512_v13  ;;  %v3731_v13 = vld [vmem:[%s3835_s9 + $0x8] sm:$0xff] }
0x1a8c   :  { %1516 = vrot.lane.b32.xlu1 %v1514_v60, %s3211_s30  ;;  %v3738_v60 = vld [vmem:[%s3835_s9] sm:$0xff]  ;;  %s3212_s9 = smov 1  }
0x1afe   :  { %v1517_v14 = vpop.permute.xlu1 %1516 }
0x1aff   :  { %1519 = vst.msk [vmem:[#allocation3 + $0x10] sm:$0xff] %vm207_vm2, %v1517_v14  ;;  %2881 = vmatmul.mubr.msk.f32.vlgmr.msra.gmra.mxu1 %vm207_vm2, %v1517_v14 }
0x1b00   :  { %2895 = vmatpush3.msra.mxu1 %v3529_v42  ;;  %2902 = vmatprep.mubr.msk.f32.mxu1 %vm3209_vm1, %v3208_v4 }
0x1b01   :  { %2896 = vmatprep.subr.mxu1 %v3208_v4 }
0x1b02   :  { %2897 = vmatpush3.msra.mxu1 %v3535_v43 }
0x1b03   :  { %2898 = vmatprep.subr.mxu1 %v3208_v4 }
0x1b04   :  { %2899 = vmatpush3.msra.mxu1 %v3542_v44 }
0x1b05   :  { %2900 = vmatprep.subr.mxu1 %v3208_v4 }
0x1b06   :  { %2901 = vmatpush3.msra.mxu1 %v3549_v45 }
0x1b07   :  { %2916 = vmatprep.subr.mxu1 %v3208_v4 }
0x1bbf   :  { %v1589_v16 = vpop.f32.mrf.mxu1 }
0x1bc0   :  { %v1593_v17 = vadd.f32 %v1589_v16, %v1167_v15  ;;  %v1182_v16 = vadd.f32 %v3593_v58, %v3649_v57 }
0x1bc1   :  { %v2882_v18 = vpop.f32.mrf.mxu1 }
0x1bc2   :  { %3084 = vtanh.f32 %v1593_v17  ;;  %v2568_v20 = vmul.f32 -1.442695, %v1593_v17 }
0x1bc4   :  { %3086 = vpow2.f32 %v2568_v20  ;;  %v3767_v20 = vld [vmem:[#allocation5] ss:$0 sm:$0xff] }
0x1bcf   :  { %v3085_v19 = vpop.eup %3084 }
0x1bd0   :  { %1603 = vrot.lane.b32.xlu0 %v3085_v19, %s3210_s27 }
0x1bd1   :  { %v3087_v21 = vpop.eup %3086 }
0x1bd2   :  { %v1597_v22 = vadd.f32 1.0, %v3087_v21 }
0x1bd4   :  { %3088 = vrcp.f32 %v1597_v22 }
0x1be1   :  { %v3089_v23 = vpop.eup %3088 }
0x1be2   :  { %v1601_v27 = vmul.f32 %v3089_v23, %v1508_v9 }
0x1c42   :  { %v1604_v24 = vpop.permute.xlu0 %1603 }
0x1c43   :  { %v1606_v26 = vmul.f32 %v3089_v23, %v1604_v24 }
0x1c45   :  { %1608 = vrot.lane.b32.xlu1 %v1606_v26, %s3211_s30 }
0x1cb7   :  { %v1609_v28 = vpop.permute.xlu1 %1608 }
0x1cb8   :  { %v1611_v29 = vadd.f32 %v1609_v28, %v1601_v27 }
0x1cba   :  { %3090 = vtanh.f32 %v1611_v29 }
0x1cc7   :  { %v3091_v30 = vpop.eup %3090 }
0x1cc8   :  { %1614 = vrot.lane.b32.xlu0 %v3091_v30, %s3210_s27 }
0x1d3a   :  { %v1615_v31 = vpop.permute.xlu0 %1614 }
0x1d3b   :  { %v1617_v32 = vmul.f32 %v3089_v23, %v1615_v31 }
0x1d3d   :  { %1619 = vrot.lane.b32.xlu1 %v1617_v32, %s3211_s30 }
0x1daf   :  { %v1620_v33 = vpop.permute.xlu1 %1619 }
0x1db0   :  { %1622 = vst.msk [vmem:[#allocation3 + $0x18] sm:$0xff] %vm207_vm2, %v1620_v33  ;;  %2892 = vmatmul.mubr.msk.f32.vlgmr.msra.gmra.mxu0 %vm207_vm2, %v1620_v33 }
0x1db1   :  { %2906 = vmatpush3.msra.mxu0 %v3529_v42  ;;  %2913 = vmatprep.mubr.msk.f32.mxu0 %vm3209_vm1, %v3208_v4 }
0x1db2   :  { %2907 = vmatprep.subr.mxu0 %v3208_v4 }
0x1db3   :  { %2908 = vmatpush3.msra.mxu0 %v3535_v43 }
0x1db4   :  { %2909 = vmatprep.subr.mxu0 %v3208_v4 }
0x1db5   :  { %2910 = vmatpush3.msra.mxu0 %v3542_v44 }
0x1db6   :  { %2911 = vmatprep.subr.mxu0 %v3208_v4 }
0x1db7   :  { %2912 = vmatpush3.msra.mxu0 %v3549_v45  ;;  %v2048_v14 = vld [vmem:[#allocation3 + $0x18] sm:$0xff] }
0x1db8   :  { %2927 = vmatprep.subr.mxu0 %v3208_v4 }
0x1e70   :  { %v1692_v35 = vpop.f32.mrf.mxu0 }
0x1e71   :  { %v1696_v36 = vadd.f32 %v1692_v35, %v1172_v34 }
0x1e72   :  { %v2893_v37 = vpop.f32.mrf.mxu0 }
0x1e73   :  { %3092 = vtanh.f32 %v1696_v36  ;;  %v2570_v39 = vmul.f32 -1.442695, %v1696_v36 }
0x1e75   :  { %3094 = vpow2.f32 %v2570_v39 }
0x1e80   :  { %v3093_v38 = vpop.eup %3092 }
0x1e81   :  { %1706 = vrot.lane.b32.xlu0 %v3093_v38, %s3210_s27 }
0x1e82   :  { %v3095_v40 = vpop.eup %3094 }
0x1e83   :  { %v1700_v63 = vadd.f32 1.0, %v3095_v40 }
0x1e85   :  { %3096 = vrcp.f32 %v1700_v63 }
0x1e92   :  { %v3097_v41 = vpop.eup %3096 }
0x1e93   :  { %v1704_v48 = vmul.f32 %v3097_v41, %v1611_v29 }
0x1ef3   :  { %v1707_v46 = vpop.permute.xlu0 %1706 }
0x1ef4   :  { %v1709_v47 = vmul.f32 %v3097_v41, %v1707_v46 }
0x1ef6   :  { %1711 = vrot.lane.b32.xlu1 %v1709_v47, %s3211_s30 }
0x1f68   :  { %v1712_v49 = vpop.permute.xlu1 %1711 }
0x1f69   :  { %v1714_v50 = vadd.f32 %v1712_v49, %v1704_v48  ;;  %v1187_v49 = vadd.f32 %v3647_v56, %v3593_v58 }
0x1f6b   :  { %3098 = vtanh.f32 %v1714_v50 }
0x1f78   :  { %v3099_v51 = vpop.eup %3098 }
0x1f79   :  { %1717 = vrot.lane.b32.xlu0 %v3099_v51, %s3210_s27 }
0x1feb   :  { %v1718_v52 = vpop.permute.xlu0 %1717 }
0x1fec   :  { %v1720_v53 = vmul.f32 %v3097_v41, %v1718_v52 }
0x1fee   :  { %1722 = vrot.lane.b32.xlu1 %v1720_v53, %s3211_s30 }
0x2060   :  { %v1723_v55 = vpop.permute.xlu1 %1722 }
0x2061   :  { %1725 = vst.msk [vmem:[#allocation3 + $0x20] sm:$0xff] %vm207_vm2, %v1723_v55  ;;  %2903 = vmatmul.mubr.msk.f32.vlgmr.msra.gmra.mxu1 %vm207_vm2, %v1723_v55 }
0x2062   :  { %2917 = vmatpush3.msra.mxu1 %v3529_v42  ;;  %2924 = vmatprep.mubr.msk.f32.mxu1 %vm3209_vm1, %v3208_v4  ;;  %v1177_v42 = vadd.f32 %v3643_v54, %v3593_v58 }
0x2063   :  { %2918 = vmatprep.subr.mxu1 %v3208_v4 }
0x2064   :  { %2919 = vmatpush3.msra.mxu1 %v3535_v43 }
0x2065   :  { %2920 = vmatprep.subr.mxu1 %v3208_v4 }
0x2066   :  { %2921 = vmatpush3.msra.mxu1 %v3542_v44 }
0x2067   :  { %2922 = vmatprep.subr.mxu1 %v3208_v4 }
0x2068   :  { %2923 = vmatpush3.msra.mxu1 %v3549_v45  ;;  %v2136_v47 = vld [vmem:[#allocation3 + $0x20] sm:$0xff] }
0x2069   :  { %2938 = vmatprep.subr.mxu1 %v3208_v4 }
0x2121   :  { %v1795_v59 = vpop.f32.mrf.mxu1 }
0x2122   :  { %v1799_v2 = vadd.f32 %v1795_v59, %v1177_v42 }
0x2123   :  { %v2904_v61 = vpop.f32.mrf.mxu1 }
0x2124   :  { %3100 = vtanh.f32 %v1799_v2  ;;  %v2572_v43 = vmul.f32 -1.442695, %v1799_v2 }
0x2126   :  { %3102 = vpow2.f32 %v2572_v43 }
0x2131   :  { %v3101_v0 = vpop.eup %3100 }
0x2132   :  { %1809 = vrot.lane.b32.xlu0 %v3101_v0, %s3210_s27 }
0x2133   :  { %v3103_v1 = vpop.eup %3102 }
0x2134   :  { %v1803_v44 = vadd.f32 1.0, %v3103_v1 }
0x2136   :  { %3104 = vrcp.f32 %v1803_v44 }
0x2143   :  { %v3105_v12 = vpop.eup %3104 }
0x2144   :  { %v1807_v3 = vmul.f32 %v3105_v12, %v1714_v50 }
0x21a4   :  { %v1810_v62 = vpop.permute.xlu0 %1809 }
0x21a5   :  { %v1812_v45 = vmul.f32 %v3105_v12, %v1810_v62 }
0x21a7   :  { %1814 = vrot.lane.b32.xlu1 %v1812_v45, %s3211_s30 }
0x2219   :  { %v1815_v6 = vpop.permute.xlu1 %1814 }
0x221a   :  { %v3707_v54 = vadd.f32 %v1815_v6, %v1807_v3 }
0x221c   :  { %3106 = vtanh.f32 %v3707_v54 }
0x2229   :  { %v3107_v5 = vpop.eup %3106 }
0x222a   :  { %1820 = vrot.lane.b32.xlu0 %v3107_v5, %s3210_s27 }
0x229c   :  { %v1821_v8 = vpop.permute.xlu0 %1820 }
0x229d   :  { %v1823_v7 = vmul.f32 %v3105_v12, %v1821_v8 }
0x229f   :  { %1825 = vrot.lane.b32.xlu1 %v1823_v7, %s3211_s30 }
0x2311   :  { %v1826_v9 = vpop.permute.xlu1 %1825 }
0x2312   :  { %1828 = vst.msk [vmem:[#allocation3 + $0x28] sm:$0xff] %vm207_vm2, %v1826_v9  ;;  %2914 = vmatmul.mubr.msk.f32.vlgmr.msra.gmra.mxu0 %vm207_vm2, %v1826_v9 }
0x2313   :  { %2928 = vmatpush3.msra.mxu0 %v3715_v10  ;;  %2935 = vmatprep.mubr.msk.f32.mxu0 %vm3209_vm1, %v3208_v4 }
0x2314   :  { %2929 = vmatprep.subr.mxu0 %v3208_v4 }
0x2315   :  { %2930 = vmatpush3.msra.mxu0 %v3722_v11 }
0x2316   :  { %2931 = vmatprep.subr.mxu0 %v3208_v4 }
0x2317   :  { %2932 = vmatpush3.msra.mxu0 %v3731_v13 }
0x2318   :  { %2933 = vmatprep.subr.mxu0 %v3208_v4 }
0x2319   :  { %2934 = vmatpush3.msra.mxu0 %v3738_v60  ;;  %v2222_v15 = vld [vmem:[#allocation3 + $0x28] sm:$0xff] }
0x231a   :  { %2936 = vmatmul.mubr.msk.f32.vlgmr.msra.gmra.mxu0 %vm207_vm2, %v2048_v14  ;;  %2949 = vmatprep.subr.mxu0 %v3208_v4 }
0x231b   :  { %2950 = vmatpush3.msra.mxu0 %v3715_v10  ;;  %2957 = vmatprep.mubr.msk.f32.mxu0 %vm3209_vm1, %v3208_v4 }
0x231c   :  { %2951 = vmatprep.subr.mxu0 %v3208_v4 }
0x231d   :  { %2952 = vmatpush3.msra.mxu0 %v3722_v11 }
0x231e   :  { %2953 = vmatprep.subr.mxu0 %v3208_v4 }
0x231f   :  { %2954 = vmatpush3.msra.mxu0 %v3731_v13 }
0x2320   :  { %2955 = vmatprep.subr.mxu0 %v3208_v4 }
0x2321   :  { %2956 = vmatpush3.msra.mxu0 %v3738_v60 }
0x2322   :  { %2958 = vmatmul.mubr.msk.f32.vlgmr.msra.gmra.mxu0 %vm207_vm2, %v2222_v15  ;;  %2971 = vmatprep.subr.mxu0 %v3208_v4 }
0x2323   :  { %2972 = vmatpush3.msra.mxu0 %v3715_v10  ;;  %2979 = vmatprep.mubr.msk.f32.mxu0 %vm3209_vm1, %v3208_v4 }
0x2324   :  { %2973 = vmatprep.subr.mxu0 %v3208_v4 }
0x2325   :  { %2974 = vmatpush3.msra.mxu0 %v3722_v11 }
0x2326   :  { %2975 = vmatprep.subr.mxu0 %v3208_v4 }
0x2327   :  { %2976 = vmatpush3.msra.mxu0 %v3731_v13 }
0x2328   :  { %2977 = vmatprep.subr.mxu0 %v3208_v4 }
0x2329   :  { %2978 = vmatpush3.msra.mxu0 %v3738_v60 }
0x23d2   :  { %v1898_v17 = vpop.f32.mrf.mxu0 }
0x23d3   :  { %v1902_v18 = vadd.f32 %v1898_v17, %v1182_v16 }
0x23d4   :  { %v2915_v19 = vpop.f32.mrf.mxu0 }
0x23d5   :  { %3108 = vtanh.f32 %v1902_v18  ;;  %v2574_v31 = vmul.f32 -1.442695, %v1902_v18 }
0x23da   :  { %v2124_v21 = vpop.f32.mrf.mxu0 }
0x23db   :  { %v2125_v22 = vadd.f32 %v3767_v20, %v2124_v21 }
0x23dc   :  { %v2937_v23 = vpop.f32.mrf.mxu0 }
0x23dd   :  { %v2579_v24 = vmul.f32 -1.442695, %v2125_v22 }
0x23df   :  { %3110 = vpow2.f32 %v2579_v24 }
0x23e2   :  { %v3109_v26 = vpop.eup %3108  ;;  %v3770_v27 = vpop.f32.mrf.mxu0 }
0x23e3   :  { %1912 = vrot.lane.b32.xlu0 %v3109_v26, %s3210_s27 }
0x23e4   :  { %v2959_v28 = vpop.f32.mrf.mxu0 }
0x23ec   :  { %v3111_v29 = vpop.eup %3110 }
0x23ed   :  { %v2131_v57 = vadd.f32 1.0, %v3111_v29 }
0x23ef   :  { %3112 = vrcp.f32 %v2131_v57 }
0x23f0   :  { %3114 = vpow2.f32 %v2574_v31 }
0x23fc   :  { %v3113_v30 = vpop.eup %3112 }
0x23fd   :  { %2135 = vst.msk [vmem:[#allocation6] sm:$0xff] %vm2134_vm3, %v3113_v30  ;;  %v3115_v32 = vpop.eup %3114 }
0x23fe   :  { %v1906_v33 = vadd.f32 1.0, %v3115_v32 }
0x2400   :  { %3116 = vrcp.f32 %v1906_v33 }
0x240d   :  { %v3117_v34 = vpop.eup %3116 }
0x240e   :  { %v1910_v37 = vmul.f32 %v3117_v34, %v3707_v54 }
0x2455   :  { %v1913_v35 = vpop.permute.xlu0 %1912 }
0x2456   :  { %v1915_v36 = vmul.f32 %v3117_v34, %v1913_v35 }
0x2458   :  { %1917 = vrot.lane.b32.xlu1 %v1915_v36, %s3211_s30 }
0x24ca   :  { %v1918_v38 = vpop.permute.xlu1 %1917 }
0x24cb   :  { %v1920_v39 = vadd.f32 %v1918_v38, %v1910_v37 }
0x24cd   :  { %3118 = vtanh.f32 %v1920_v39 }
0x24da   :  { %v3119_v40 = vpop.eup %3118 }
0x24db   :  { %1923 = vrot.lane.b32.xlu0 %v3119_v40, %s3210_s27 }
0x254d   :  { %v1924_v63 = vpop.permute.xlu0 %1923 }
0x254e   :  { %v1926_v41 = vmul.f32 %v3117_v34, %v1924_v63 }
0x2550   :  { %1928 = vrot.lane.b32.xlu1 %v1926_v41, %s3211_s30 }
0x25c2   :  { %v1929_v46 = vpop.permute.xlu1 %1928 }
0x25c3   :  { %1931 = vst.msk [vmem:[#allocation3 + $0x30] sm:$0xff] %vm207_vm2, %v1929_v46  ;;  %2925 = vmatmul.mubr.msk.f32.vlgmr.msra.gmra.mxu1 %vm207_vm2, %v1929_v46 }
0x25c4   :  { %2939 = vmatpush3.msra.mxu1 %v3715_v10  ;;  %2946 = vmatprep.mubr.msk.f32.mxu1 %vm3209_vm1, %v3208_v4 }
0x25c5   :  { %2940 = vmatprep.subr.mxu1 %v3208_v4 }
0x25c6   :  { %2941 = vmatpush3.msra.mxu1 %v3722_v11 }
0x25c7   :  { %2942 = vmatprep.subr.mxu1 %v3208_v4 }
0x25c8   :  { %2943 = vmatpush3.msra.mxu1 %v3731_v13 }
0x25c9   :  { %2944 = vmatprep.subr.mxu1 %v3208_v4 }
0x25ca   :  { %2945 = vmatpush3.msra.mxu1 %v3738_v60  ;;  %v2308_v48 = vld [vmem:[#allocation3 + $0x30] sm:$0xff] }
0x25cb   :  { %2947 = vmatmul.mubr.msk.f32.vlgmr.msra.gmra.mxu1 %vm207_vm2, %v2136_v47  ;;  %2960 = vmatprep.subr.mxu1 %v3208_v4 }
0x25cc   :  { %2961 = vmatpush3.msra.mxu1 %v3715_v10  ;;  %2968 = vmatprep.mubr.msk.f32.mxu1 %vm3209_vm1, %v3208_v4 }
0x25cd   :  { %2962 = vmatprep.subr.mxu1 %v3208_v4 }
0x25ce   :  { %2963 = vmatpush3.msra.mxu1 %v3722_v11 }
0x25cf   :  { %2964 = vmatprep.subr.mxu1 %v3208_v4 }
0x25d0   :  { %2965 = vmatpush3.msra.mxu1 %v3731_v13  ;;  %v2293_v13 = vadd.f32 %v3767_v20, %v3770_v27 }
0x25d1   :  { %2966 = vmatprep.subr.mxu1 %v3208_v4 }
0x25d2   :  { %2967 = vmatpush3.msra.mxu1 %v3738_v60  ;;  %v2583_v60 = vmul.f32 -1.442695, %v2293_v13 }
0x25d3   :  { %2969 = vmatmul.mubr.msk.f32.vlgmr.msra.gmra.mxu1 %vm207_vm2, %v2308_v48 }
0x2683   :  { %v2001_v50 = vpop.f32.mrf.mxu1 }
0x2684   :  { %v2005_v51 = vadd.f32 %v2001_v50, %v1187_v49 }
0x2685   :  { %v2926_v52 = vpop.f32.mrf.mxu1 }
0x2686   :  { %3120 = vtanh.f32 %v2005_v51  ;;  %v2576_v4 = vmul.f32 -1.442695, %v2005_v51 }
0x2688   :  { %3122 = vpow2.f32 %v2576_v4 }
0x268b   :  { %v2206_v53 = vpop.f32.mrf.mxu1 }
0x268c   :  { %v2207_v58 = vadd.f32 %v3767_v20, %v2206_v53 }
0x268d   :  { %v2948_v55 = vpop.f32.mrf.mxu1 }
0x268e   :  { %v2581_v56 = vmul.f32 -1.442695, %v2207_v58 }
0x2693   :  { %v3121_v42 = vpop.eup %3120  ;;  %v2378_v59 = vpop.f32.mrf.mxu1 }
0x2694   :  { %2015 = vrot.lane.b32.xlu0 %v3121_v42, %s3210_s27  ;;  %v2379_v12 = vadd.f32 %v3767_v20, %v2378_v59 }
0x2695   :  { %v2970_v2 = vpop.f32.mrf.mxu1  ;;  %v3123_v61 = vpop.eup %3122 }
0x2696   :  { %v2009_v0 = vadd.f32 1.0, %v3123_v61  ;;  %v2585_v62 = vmul.f32 -1.442695, %v2379_v12 }
0x2698   :  { %3124 = vrcp.f32 %v2009_v0 }
0x2699   :  { %3126 = vpow2.f32 %v2581_v56 }
0x269a   :  { %3128 = vpow2.f32 %v2585_v62 }
0x26a5   :  { %v3125_v43 = vpop.eup %3124 }
0x26a6   :  { %v2013_v45 = vmul.f32 %v3125_v43, %v1920_v39  ;;  %v3127_v3 = vpop.eup %3126 }
0x26a7   :  { %v2213_v5 = vadd.f32 1.0, %v3127_v3  ;;  %v3129_v8 = vpop.eup %3128 }
0x26a8   :  { %v2385_v7 = vadd.f32 1.0, %v3129_v8 }
0x2706   :  { %v2016_v1 = vpop.permute.xlu0 %2015 }
0x2707   :  { %v2018_v44 = vmul.f32 %v3125_v43, %v2016_v1 }
0x2709   :  { %2020 = vrot.lane.b32.xlu1 %v2018_v44, %s3211_s30 }
0x277b   :  { %v2021_v6 = vpop.permute.xlu1 %2020 }
0x277c   :  { %v2023_v54 = vadd.f32 %v2021_v6, %v2013_v45 }
0x277e   :  { %3130 = vtanh.f32 %v2023_v54 }
0x277f   :  { %3132 = vrcp.f32 %v2213_v5 }
0x2780   :  { %3134 = vrcp.f32 %v2385_v7 }
0x2781   :  { %3136 = vpow2.f32 %v2583_v60 }
0x278b   :  { %v3131_v10 = vpop.eup %3130 }
0x278c   :  { %2026 = vrot.lane.b32.xlu0 %v3131_v10, %s3210_s27  ;;  %v3133_v9 = vpop.eup %3132  ;;  %s3215_s27 = smov 2  }
0x278d   :  { %v3135_v11 = vpop.eup %3134 }
0x278e   :  { %v3137_v14 = vpop.eup %3136 }
0x278f   :  { %v2299_v15 = vadd.f32 1.0, %v3137_v14 }
0x2790   :  { %2217 = vrot.lane.b32.xlu0 %v3133_v9, %s3212_s9 }
0x2791   :  { %3138 = vrcp.f32 %v2299_v15 }
0x2794   :  { %2389 = vrot.lane.b32.xlu0 %v3135_v11, %s3213_s26 }
0x2798   :  { %2038 = vrot.lane.b32.xlu0 %v2023_v54, %s3214_s28 }
0x279e   :  { %v3139_v19 = vpop.eup %3138 }
0x27fe   :  { %v2027_v16 = vpop.permute.xlu0 %2026 }
0x27ff   :  { %v2029_v17 = vmul.f32 %v3125_v43, %v2027_v16 }
0x2801   :  { %2031 = vrot.lane.b32.xlu1 %v2029_v17, %s3211_s30  ;;  %s3216_s30 = smov [#allocation8]  }
0x2802   :  { %v2218_v18 = vpop.permute.xlu0 %2217  ;;  %s2495_s29 = sshll.u32 %s3216_s30, 4  ;;  %s2496_s29 = int_to_ptr.vmem [resolvable:$true] %s2495_s29 }
0x2803   :  { %2221 = vst.msk [vmem:[#allocation6] sm:$0xff] %vm2220_vm4, %v2218_v18  ;;  %s3144_s6 = scalar_lea.vmem %s2496_s29, 256  ;;  %p3149_p1 = scmp.lt.s32.totalorder %s2496_s29, %s2496_s29 }
0x2804   :  { %p3145_p0 = scmp.ne.s32.totalorder %s2496_s29, %s3144_s6  ;;  %p3150_p2 = scmp.lt.s32.totalorder %s3144_s6, %s3144_s6 }
0x2805   :  { %2303 = vrot.lane.b32.xlu1 %v3139_v19, %s3215_s27 }
0x2806   :  { %v2390_v21 = vpop.permute.xlu0 %2389  ;;  %p3151_p3 = por %p3150_p2, %p3149_p1 }
0x2808   :  { %p3152_p4 = pnand %p3151_p3, %p3145_p0 }
0x2809   :  { %1038 = vrot.lane.b32.xlu1 %v3610_v25, %s3214_s28 }
0x280a   :  { %v2039_v22 = vpop.permute.xlu0 %2038 }
0x280b   :  { %2042 = vst.msk [vmem:[#allocation10 + $0x8] sm:$0xff] %vm207_vm2, %v2039_v22 }
0x2873   :  { %v2032_v23 = vpop.permute.xlu1 %2031 }
0x2874   :  { %2034 = vst.msk [vmem:[#allocation3 + $0x38] sm:$0xff] %vm207_vm2, %v2032_v23  ;;  %2036 = vst.msk [vmem:[#allocation8 + $0x8] sm:$0xff] %vm207_vm2, %v2032_v23 }
0x2877   :  { %v2304_v24 = vpop.permute.xlu1 %2303 }
0x2878   :  { %2307 = vst.msk [vmem:[#allocation6] sm:$0xff] %vm2306_vm5, %v2304_v24 }
0x2879   :  { %2393 = vst.msk [vmem:[#allocation6] sm:$0xff] %vm2392_vm6, %v2390_v21 }
0x287b   :  { %v1039_v26 = vpop.permute.xlu1 %1038  ;;  %v2394_v27 = vld [vmem:[#allocation3 + $0x38] sm:$0xff] }
0x287c   :  { %1041 = vst.msk [vmem:[#allocation10] sm:$0xff] %vm207_vm2, %v1039_v26  ;;  %2980 = vmatmul.mubr.msk.f32.vlgmr.msra.gmra.mxu0 %vm207_vm2, %v2394_v27 }
0x293c   :  { %v2464_v25 = vpop.f32.mrf.mxu0 }
0x293d   :  { %v2465_v28 = vadd.f32 %v3767_v20, %v2464_v25 }
0x293e   :  { %v2981_v29 = vpop.f32.mrf.mxu0 }
0x293f   :  { %v2587_v57 = vmul.f32 -1.442695, %v2465_v28 }
0x2941   :  { %3140 = vpow2.f32 %v2587_v57 }
0x294e   :  { %v3141_v30 = vpop.eup %3140 }
0x294f   :  { %v2471_v31 = vadd.f32 1.0, %v3141_v30 }
0x2951   :  { %3142 = vrcp.f32 %v2471_v31 }
0x2952   :  { %3155 = shalt.err (!%p3152_p4)
}
0x2953   :  { %s3217_s5 = smov 128   ;;  %s3218_s14 = smov 8  }
0x2954   :  { %2501 = dma.vmem_to_hbm [thread:$0]  %s2496_s29, 256, %s3838_s12, [#allocation9], %s3217_s5, %s3217_s5, %s3218_s14  }
0x2955   :  { %s3219_s16 = smov [#allocation10]  }
0x2956   :  { %s2507_s17 = sshll.u32 %s3219_s16, 4  ;;  %s2508_s17 = int_to_ptr.vmem [resolvable:$true] %s2507_s17 }
0x2957   :  { %s3164_s18 = scalar_lea.vmem %s2508_s17, 256  ;;  %p3169_p6 = scmp.lt.s32.totalorder %s2508_s17, %s2508_s17 }
0x2958   :  { %p3165_p5 = scmp.ne.s32.totalorder %s2508_s17, %s3164_s18  ;;  %p3170_p7 = scmp.lt.s32.totalorder %s3164_s18, %s3164_s18 }
0x295a   :  { %p3171_p8 = por %p3170_p7, %p3169_p6 }
0x295c   :  { %p3172_p9 = pnand %p3171_p8, %p3165_p5 }
0x295e   :  { %3175 = shalt.err (!%p3172_p9)
}
0x295f   :  { %2513 = dma.vmem_to_hbm [thread:$0]  %s2508_s17, 256, %s3839_s13, [#allocation9], %s3217_s5, %s3217_s5, %s3218_s14   ;;  %v3143_v20 = vpop.eup %3142  ;;  %vm2478_vm7 = vcmask 39968  }
0x2960   :  { %s3220_s2 = smov 4   ;;  %s3221_s7 = smov [#allocation6]  }
0x2961   :  { %2475 = vrot.lane.b32.xlu1 %v3143_v20, %s3220_s2  ;;  %s2486_s1 = sshll.u32 %s3221_s7, 4  ;;  %s2487_s1 = int_to_ptr.vmem [resolvable:$true] %s2486_s1 }
0x2962   :  { %s3184_s12 = scalar_lea.vmem %s2487_s1, 128  ;;  %p3189_p11 = scmp.lt.s32.totalorder %s2487_s1, %s2487_s1 }
0x2963   :  { %p3185_p10 = scmp.ne.s32.totalorder %s2487_s1, %s3184_s12  ;;  %p3190_p12 = scmp.lt.s32.totalorder %s3184_s12, %s3184_s12 }
0x2965   :  { %p3191_p13 = por %p3190_p12, %p3189_p11 }
0x2967   :  { %p3192_p0 = pnand %p3191_p13, %p3185_p10 }
0x29d3   :  { %v2476_v32 = vpop.permute.xlu1 %2475 }
0x29d4   :  { %2479 = vst.msk [vmem:[#allocation6] sm:$0xff] %vm2478_vm7, %v2476_v32 }
0x29d5   :  { %3195 = shalt.err (!%p3192_p0)
}
0x29d6   :  { %2489 = dma.vmem_to_hbm [thread:$0]  %s2487_s1, 128, %s3837_s11, [#allocation7]  }
0x29d7   :  { %3204 = dma.done.wait [#allocation7], 128  }
0x29d8   :  { %3205 = vsyncadd [#allocation7], 4294967168 }
0x29d9   :  { %3206 = dma.done.wait [#allocation9], 512  }
0x29da   :  { %3207 = vsyncadd [#allocation9], 4294966784 }
0x29db   :  { %2523 = vsyncpa [#allocation7], 1 }
0x29dc   :  { %2524 = vsyncpa [#allocation9], 1 }

</bundles_post_ra>
